<compile_context>
chip_gen: v7x
topology: tpu7x:2x2x1
jax: 0.10.0
libtpu: 0.0.40
codegen_flags: <defaults>
</compile_context>

<pallas_src>
import functools

import jax
import jax.numpy as jnp
from jax.experimental import pallas as pl
from jax.experimental.pallas import tpu as pltpu

HIDDEN = 512


def _round_up(x, m):
    return ((x + m - 1) // m) * m


# --------------------------- Pallas kernel ----------------------------------

def _mlp_kernel(x_ref, w1_ref, b1_ref, w2_ref, b2_ref, w3_ref, b3_ref,
                w4_ref, b4_ref, o_ref):
    # All matmuls run on the MXU with bf16 inputs and f32 accumulation.
    h = jnp.dot(x_ref[...], w1_ref[...], preferred_element_type=jnp.float32)
    h = jnp.maximum(h + b1_ref[...], 0.0).astype(jnp.bfloat16)

    h = jnp.dot(h, w2_ref[...], preferred_element_type=jnp.float32)
    h = jnp.maximum(h + b2_ref[...], 0.0).astype(jnp.bfloat16)

    h = jnp.dot(h, w3_ref[...], preferred_element_type=jnp.float32)
    h = jnp.maximum(h + b3_ref[...], 0.0).astype(jnp.bfloat16)

    out = jnp.dot(h, w4_ref[...], preferred_element_type=jnp.float32) + b4_ref[...]
    o_ref[...] = out.astype(o_ref.dtype)


# --------------------------- Wrapper -----------------------------------------

@functools.partial(jax.jit, static_argnames=("output_dim",))
def mlp_forward(x, params, *, output_dim):
    """x: any shape (B, ...) -> flatten -> 4-layer MLP -> (B, output_dim)."""
    w1, b1, w2, b2, w3, b3, w4, b4 = params

    B = x.shape[0]
    x = x.reshape(B, -1).astype(jnp.float32)          # nn.Flatten
    D_in = x.shape[1]

    # --- pad shapes to TPU-friendly sizes -------------------------------------
    D_pad = _round_up(D_in, 128)                      # lane-aligned K
    N_out = w4.shape[1]
    N_pad = _round_up(N_out, 128)                     # lane-dense output stores
    tm = 256 if B >= 256 else _round_up(B, 8)         # sublane-aligned M tile
    M_pad = _round_up(B, tm)

    xb = jnp.zeros((M_pad, D_pad), jnp.bfloat16).at[:B, :D_in].set(
        x.astype(jnp.bfloat16))

    w1p = jnp.zeros((D_pad, HIDDEN), jnp.bfloat16).at[:D_in, :].set(
        w1.astype(jnp.bfloat16))
    w4p = jnp.zeros((HIDDEN, N_pad), jnp.bfloat16).at[:, :N_out].set(
        w4.astype(jnp.bfloat16))
    b4p = jnp.zeros((1, N_pad), jnp.float32).at[0, :N_out].set(b4)

    w2b = w2.astype(jnp.bfloat16)
    w3b = w3.astype(jnp.bfloat16)
    b1r = b1.reshape(1, HIDDEN).astype(jnp.float32)
    b2r = b2.reshape(1, HIDDEN).astype(jnp.float32)
    b3r = b3.reshape(1, HIDDEN).astype(jnp.float32)

    grid = (M_pad // tm,)
    inv = lambda i: (0, 0)                            # grid-invariant blocks

    out = pl.pallas_call(
        _mlp_kernel,
        out_shape=jax.ShapeDtypeStruct((M_pad, N_pad), jnp.float32),
        grid=grid,
        in_specs=[
            pl.BlockSpec((tm, D_pad), lambda i: (i, 0)),
            pl.BlockSpec((D_pad, HIDDEN), inv),
            pl.BlockSpec((1, HIDDEN), inv),
            pl.BlockSpec((HIDDEN, HIDDEN), inv),
            pl.BlockSpec((1, HIDDEN), inv),
            pl.BlockSpec((HIDDEN, HIDDEN), inv),
            pl.BlockSpec((1, HIDDEN), inv),
            pl.BlockSpec((HIDDEN, N_pad), inv),
            pl.BlockSpec((1, N_pad), inv),
        ],
        out_specs=pl.BlockSpec((tm, N_pad), lambda i: (i, 0)),
        compiler_params=pltpu.CompilerParams(
            dimension_semantics=("parallel",),
        ),
    )(xb, w1p, b1r, w2b, b2r, w3b, b3r, w4p, b4p)

    return out[:B, :N_out]


# --------------------------- Parameter init -----------------------------------

def init_params(key, input_dim, output_dim):
    ks = jax.random.split(key, 8)
    def lin(kw, kb, fan_in, fan_out):
        w = jax.random.normal(kw, (fan_in, fan_out), jnp.float32) * jnp.sqrt(2.0 / fan_in)
        b = 0.01 * jax.random.normal(kb, (fan_out,), jnp.float32)
        return w, b
    w1, b1 = lin(ks[0], ks[1], input_dim, HIDDEN)
    w2, b2 = lin(ks[2], ks[3], HIDDEN, HIDDEN)
    w3, b3 = lin(ks[4], ks[5], HIDDEN, HIDDEN)
    w4, b4 = lin(ks[6], ks[7], HIDDEN, output_dim)
    return (w1, b1, w2, b2, w3, b3, w4, b4)


def reference_forward(x, params):
    """Plain-JAX reference with the same bf16-in / f32-accumulate rounding."""
    w1, b1, w2, b2, w3, b3, w4, b4 = params
    h = x.reshape(x.shape[0], -1).astype(jnp.bfloat16)
    def mm(a, w):
        return jnp.dot(a, w.astype(jnp.bfloat16),
                       preferred_element_type=jnp.float32)
    h = jnp.maximum(mm(h, w1) + b1, 0.0).astype(jnp.bfloat16)
    h = jnp.maximum(mm(h, w2) + b2, 0.0).astype(jnp.bfloat16)
    h = jnp.maximum(mm(h, w3) + b3, 0.0).astype(jnp.bfloat16)
    return mm(h, w4) + b4


# --------------------------- Main ---------------------------------------------

if __name__ == "__main__":
    key = jax.random.PRNGKey(0)
    key, pkey, xkey = jax.random.split(key, 3)

    # Small shapes consistent with the module: flatten(2, 4, 16, 16) -> input_dim=1024.
    x = jax.random.normal(xkey, (2, 4, 16, 16), jnp.float32)
    input_dim = 4 * 16 * 16
    output_dim = 10

    params = init_params(pkey, input_dim, output_dim)

    out = mlp_forward(x, params, output_dim=output_dim)
    out = jax.block_until_ready(out)

    assert out.shape == (2, output_dim)
    assert bool(jnp.all(jnp.isfinite(out)))

    ref = reference_forward(x, params)
    err = float(jnp.max(jnp.abs(out - ref)))
    scale = float(jnp.max(jnp.abs(ref))) + 1e-6
    assert err <= 0.02 * scale + 1e-2, f"mismatch: {err} vs scale {scale}"

    print("KERNEL_OK")
</pallas_src>

<mosaic_0001>
module attributes {stable_mosaic.version = 11 : i64} {
  func.func @_mlp_kernel(%arg0: i32, %arg1: memref<8x1024xbf16, #tpu.memory_space<vmem>>, %arg2: memref<1024x512xbf16, #tpu.memory_space<vmem>>, %arg3: memref<1x512xf32, #tpu.memory_space<vmem>>, %arg4: memref<512x512xbf16, #tpu.memory_space<vmem>>, %arg5: memref<1x512xf32, #tpu.memory_space<vmem>>, %arg6: memref<512x512xbf16, #tpu.memory_space<vmem>>, %arg7: memref<1x512xf32, #tpu.memory_space<vmem>>, %arg8: memref<512x128xbf16, #tpu.memory_space<vmem>>, %arg9: memref<1x128xf32, #tpu.memory_space<vmem>>, %arg10: memref<8x128xf32, #tpu.memory_space<vmem>>) attributes {dimension_semantics = [#tpu.dimension_semantics<parallel>], iteration_bounds = array<i64: 1>, scalar_prefetch = 0 : i64, scratch_operands = 0 : i64, tpu.core_type = #tpu.core_type<tc>, window_params = [{transform_indices = @transform_0, window_bounds = array<i64: 8, 1024>}, {pipeline_mode = #tpu.pipeline_mode<synchronous>, transform_indices = @transform_1, window_bounds = array<i64: 1024, 512>}, {pipeline_mode = #tpu.pipeline_mode<synchronous>, transform_indices = @transform_2, window_bounds = array<i64: 1, 512>}, {pipeline_mode = #tpu.pipeline_mode<synchronous>, transform_indices = @transform_3, window_bounds = array<i64: 512, 512>}, {pipeline_mode = #tpu.pipeline_mode<synchronous>, transform_indices = @transform_4, window_bounds = array<i64: 1, 512>}, {pipeline_mode = #tpu.pipeline_mode<synchronous>, transform_indices = @transform_5, window_bounds = array<i64: 512, 512>}, {pipeline_mode = #tpu.pipeline_mode<synchronous>, transform_indices = @transform_6, window_bounds = array<i64: 1, 512>}, {pipeline_mode = #tpu.pipeline_mode<synchronous>, transform_indices = @transform_7, window_bounds = array<i64: 512, 128>}, {pipeline_mode = #tpu.pipeline_mode<synchronous>, transform_indices = @transform_8, window_bounds = array<i64: 1, 128>}, {transform_indices = @transform_9, window_bounds = array<i64: 8, 128>}]} {
    %c0 = arith.constant 0 : index
    %c0_0 = arith.constant 0 : index
    %0 = vector.load %arg1[%c0, %c0_0] : memref<8x1024xbf16, #tpu.memory_space<vmem>>, vector<8x1024xbf16>
    %c0_1 = arith.constant 0 : index
    %c0_2 = arith.constant 0 : index
    %1 = vector.load %arg2[%c0_1, %c0_2] : memref<1024x512xbf16, #tpu.memory_space<vmem>>, vector<1024x512xbf16>
    %cst = arith.constant dense<0.000000e+00> : vector<8x512xf32>
    %2 = tpu.matmul %0, %1, %cst {dimension_numbers = #tpu.dot_dimension_numbers<[1], [0], [0], [1], [0, 0, 1, 1], [], []>} : vector<8x1024xbf16>, vector<1024x512xbf16>, vector<8x512xf32> -> vector<8x512xf32>
    %c0_3 = arith.constant 0 : index
    %c0_4 = arith.constant 0 : index
    %3 = vector.load %arg3[%c0_3, %c0_4] : memref<1x512xf32, #tpu.memory_space<vmem>>, vector<1x512xf32>
    %4 = vector.broadcast %3 : vector<1x512xf32> to vector<8x512xf32>
    %5 = arith.addf %2, %4 : vector<8x512xf32>
    %cst_5 = arith.constant 0.000000e+00 : f32
    %6 = vector.broadcast %cst_5 : f32 to vector<8x512xf32>
    %7 = arith.maximumf %5, %6 : vector<8x512xf32>
    %8 = arith.truncf %7 : vector<8x512xf32> to vector<8x512xbf16>
    %c0_6 = arith.constant 0 : index
    %c0_7 = arith.constant 0 : index
    %9 = vector.load %arg4[%c0_6, %c0_7] : memref<512x512xbf16, #tpu.memory_space<vmem>>, vector<512x512xbf16>
    %cst_8 = arith.constant dense<0.000000e+00> : vector<8x512xf32>
    %10 = tpu.matmul %8, %9, %cst_8 {dimension_numbers = #tpu.dot_dimension_numbers<[1], [0], [0], [1], [0, 0, 1, 1], [], []>} : vector<8x512xbf16>, vector<512x512xbf16>, vector<8x512xf32> -> vector<8x512xf32>
    %c0_9 = arith.constant 0 : index
    %c0_10 = arith.constant 0 : index
    %11 = vector.load %arg5[%c0_9, %c0_10] : memref<1x512xf32, #tpu.memory_space<vmem>>, vector<1x512xf32>
    %12 = vector.broadcast %11 : vector<1x512xf32> to vector<8x512xf32>
    %13 = arith.addf %10, %12 : vector<8x512xf32>
    %cst_11 = arith.constant 0.000000e+00 : f32
    %14 = vector.broadcast %cst_11 : f32 to vector<8x512xf32>
    %15 = arith.maximumf %13, %14 : vector<8x512xf32>
    %16 = arith.truncf %15 : vector<8x512xf32> to vector<8x512xbf16>
    %c0_12 = arith.constant 0 : index
    %c0_13 = arith.constant 0 : index
    %17 = vector.load %arg6[%c0_12, %c0_13] : memref<512x512xbf16, #tpu.memory_space<vmem>>, vector<512x512xbf16>
    %cst_14 = arith.constant dense<0.000000e+00> : vector<8x512xf32>
    %18 = tpu.matmul %16, %17, %cst_14 {dimension_numbers = #tpu.dot_dimension_numbers<[1], [0], [0], [1], [0, 0, 1, 1], [], []>} : vector<8x512xbf16>, vector<512x512xbf16>, vector<8x512xf32> -> vector<8x512xf32>
    %c0_15 = arith.constant 0 : index
    %c0_16 = arith.constant 0 : index
    %19 = vector.load %arg7[%c0_15, %c0_16] : memref<1x512xf32, #tpu.memory_space<vmem>>, vector<1x512xf32>
    %20 = vector.broadcast %19 : vector<1x512xf32> to vector<8x512xf32>
    %21 = arith.addf %18, %20 : vector<8x512xf32>
    %cst_17 = arith.constant 0.000000e+00 : f32
    %22 = vector.broadcast %cst_17 : f32 to vector<8x512xf32>
    %23 = arith.maximumf %21, %22 : vector<8x512xf32>
    %24 = arith.truncf %23 : vector<8x512xf32> to vector<8x512xbf16>
    %c0_18 = arith.constant 0 : index
    %c0_19 = arith.constant 0 : index
    %25 = vector.load %arg8[%c0_18, %c0_19] : memref<512x128xbf16, #tpu.memory_space<vmem>>, vector<512x128xbf16>
    %cst_20 = arith.constant dense<0.000000e+00> : vector<8x128xf32>
    %26 = tpu.matmul %24, %25, %cst_20 {dimension_numbers = #tpu.dot_dimension_numbers<[1], [0], [0], [1], [0, 0, 1, 1], [], []>} : vector<8x512xbf16>, vector<512x128xbf16>, vector<8x128xf32> -> vector<8x128xf32>
    %c0_21 = arith.constant 0 : index
    %c0_22 = arith.constant 0 : index
    %27 = vector.load %arg9[%c0_21, %c0_22] : memref<1x128xf32, #tpu.memory_space<vmem>>, vector<1x128xf32>
    %28 = vector.broadcast %27 : vector<1x128xf32> to vector<8x128xf32>
    %29 = arith.addf %26, %28 : vector<8x128xf32>
    %c0_23 = arith.constant 0 : index
    %c0_24 = arith.constant 0 : index
    %30 = vector.load %arg10[%c0_23, %c0_24] : memref<8x128xf32, #tpu.memory_space<vmem>>, vector<8x128xf32>
    tpu.vector_store %arg10[%c0_23, %c0_24], %29 {strides = array<i32>} : memref<8x128xf32, #tpu.memory_space<vmem>>, vector<8x128xf32>,
    return
  }
  func.func @transform_0(%arg0: i32) -> (i32, i32) {
    %c0_i32 = arith.constant 0 : i32
    %c0_i32_0 = arith.constant 0 : i32
    return %arg0, %c0_i32 : i32, i32
  }
  func.func @transform_1(%arg0: i32) -> (i32, i32) {
    %c0_i32 = arith.constant 0 : i32
    %c0_i32_0 = arith.constant 0 : i32
    %c0_i32_1 = arith.constant 0 : i32
    return %c0_i32, %c0_i32_0 : i32, i32
  }
  func.func @transform_2(%arg0: i32) -> (i32, i32) {
    %c0_i32 = arith.constant 0 : i32
    %c0_i32_0 = arith.constant 0 : i32
    %c0_i32_1 = arith.constant 0 : i32
    return %c0_i32, %c0_i32_0 : i32, i32
  }
  func.func @transform_3(%arg0: i32) -> (i32, i32) {
    %c0_i32 = arith.constant 0 : i32
    %c0_i32_0 = arith.constant 0 : i32
    %c0_i32_1 = arith.constant 0 : i32
    return %c0_i32, %c0_i32_0 : i32, i32
  }
  func.func @transform_4(%arg0: i32) -> (i32, i32) {
    %c0_i32 = arith.constant 0 : i32
    %c0_i32_0 = arith.constant 0 : i32
    %c0_i32_1 = arith.constant 0 : i32
    return %c0_i32, %c0_i32_0 : i32, i32
  }
  func.func @transform_5(%arg0: i32) -> (i32, i32) {
    %c0_i32 = arith.constant 0 : i32
    %c0_i32_0 = arith.constant 0 : i32
    %c0_i32_1 = arith.constant 0 : i32
    return %c0_i32, %c0_i32_0 : i32, i32
  }
  func.func @transform_6(%arg0: i32) -> (i32, i32) {
    %c0_i32 = arith.constant 0 : i32
    %c0_i32_0 = arith.constant 0 : i32
    %c0_i32_1 = arith.constant 0 : i32
    return %c0_i32, %c0_i32_0 : i32, i32
  }
  func.func @transform_7(%arg0: i32) -> (i32, i32) {
    %c0_i32 = arith.constant 0 : i32
    %c0_i32_0 = arith.constant 0 : i32
    %c0_i32_1 = arith.constant 0 : i32
    return %c0_i32, %c0_i32_0 : i32, i32
  }
  func.func @transform_8(%arg0: i32) -> (i32, i32) {
    %c0_i32 = arith.constant 0 : i32
    %c0_i32_0 = arith.constant 0 : i32
    %c0_i32_1 = arith.constant 0 : i32
    return %c0_i32, %c0_i32_0 : i32, i32
  }
  func.func @transform_9(%arg0: i32) -> (i32, i32) {
    %c0_i32 = arith.constant 0 : i32
    %c0_i32_0 = arith.constant 0 : i32
    return %arg0, %c0_i32 : i32, i32
  }
}

</mosaic_0001>

<bundles_post_ra>
// kernel: mlp_forward.1
= control target key start
LH: loop header
LB: loop body
LE: loop exit
PB: predicated region body
PF: predicated region fallthrough
CT: control target
= control target key end

     0   :  { %s7459_s1 = inlined_call_operand.vmem [shape: bf16[1024,512], index: 1, kind: input, shape index: {}]   ;;  %s7460_s0 = inlined_call_operand.vmem [shape: bf16[8,1024], index: 0, kind: input, shape index: {}]   ;;  %s7461_s3 = inlined_call_operand.vmem [shape: bf16[512,512], index: 3, kind: input, shape index: {}]   ;;  %s7462_s5 = inlined_call_operand.vmem [shape: bf16[512,512], index: 5, kind: input, shape index: {}]   ;;  %s7463_s2 = inlined_call_operand.vmem [shape: f32[1,512], index: 2, kind: input, shape index: {}]   ;;  %s7464_s7 = inlined_call_operand.vmem [shape: bf16[512,128], index: 7, kind: input, shape index: {}]   ;;  %s7465_s4 = inlined_call_operand.vmem [shape: f32[1,512], index: 4, kind: input, shape index: {}]   ;;  %s7466_s6 = inlined_call_operand.vmem [shape: f32[1,512], index: 6, kind: input, shape index: {}]   ;;  %s7467_s8 = inlined_call_operand.vmem [shape: f32[1,128], index: 8, kind: input, shape index: {}]   ;;  %s7468_s9 = inlined_call_operand.vmem [shape: f32[8,128], index: 9, kind: output, shape index: {}]  }
   0x1   :  { %v4880_v0 = vld [vmem:[%s7459_s1 + $0x4] ss:$16 sps:$4 sm:$0xff]   ;;  %v4882_v1 = vld [vmem:[%s7459_s1 + $0xc] ss:$16 sps:$4 sm:$0xff]   ;;  %v4884_v2 = vld [vmem:[%s7459_s1] ss:$16 sps:$4 sm:$0xff]  }
   0x2   :  { %1623 = vmatprep.subr.bf16.mxu0 %v4880_v0  ;;  %v4885_v3 = vld [vmem:[%s7459_s1 + $0x8] ss:$16 sps:$4 sm:$0xff]   ;;  %1787 = vmatprep.subr.bf16.mxu1 %v4882_v1  ;;  %v4886_v4 = vld [vmem:[%s7459_s1 + $0x24] ss:$16 sps:$4 sm:$0xff]   ;;  %v4888_v5 = vld [vmem:[%s7459_s1 + $0x2c] ss:$16 sps:$4 sm:$0xff]  }
   0x3   :  { %1624 = vmatpush1.bf16.msra.mxu0 %v4884_v2  ;;  %1788 = vmatpush1.bf16.msra.mxu1 %v4885_v3  ;;  %v4890_v6 = vld [vmem:[%s7459_s1 + $0x20] ss:$16 sps:$4 sm:$0xff]   ;;  %v4891_v7 = vld [vmem:[%s7459_s1 + $0x28] ss:$16 sps:$4 sm:$0xff]   ;;  %v4892_v8 = vld [vmem:[%s7459_s1 + $0x44] ss:$16 sps:$4 sm:$0xff]  }
   0x4   :  { %1625 = vmatprep.subr.bf16.mxu0 %v4886_v4  ;;  %1789 = vmatprep.subr.bf16.mxu1 %v4888_v5  ;;  %v4894_v9 = vld [vmem:[%s7459_s1 + $0x4c] ss:$16 sps:$4 sm:$0xff]   ;;  %v4896_v10 = vld [vmem:[%s7459_s1 + $0x40] ss:$16 sps:$4 sm:$0xff]   ;;  %v4897_v11 = vld [vmem:[%s7459_s1 + $0x48] ss:$16 sps:$4 sm:$0xff]  }
   0x5   :  { %v4898_v12 = vld [vmem:[%s7459_s1 + $0x64] ss:$16 sps:$4 sm:$0xff]   ;;  %v4900_v13 = vld [vmem:[%s7459_s1 + $0x6c] ss:$16 sps:$4 sm:$0xff]   ;;  %v4902_v14 = vld [vmem:[%s7459_s1 + $0x60] ss:$16 sps:$4 sm:$0xff]  }
   0x6   :  { %v4903_v15 = vld [vmem:[%s7459_s1 + $0x68] ss:$16 sps:$4 sm:$0xff]   ;;  %v4904_v16 = vld [vmem:[%s7459_s1 + $0x84] ss:$16 sps:$4 sm:$0xff]   ;;  %v4906_v17 = vld [vmem:[%s7459_s1 + $0x8c] ss:$16 sps:$4 sm:$0xff]  }
   0x7   :  { %1626 = vmatpush1.bf16.msra.mxu0 %v4890_v6  ;;  %1790 = vmatpush1.bf16.msra.mxu1 %v4891_v7  ;;  %v4908_v18 = vld [vmem:[%s7459_s1 + $0x80] ss:$16 sps:$4 sm:$0xff]   ;;  %v4909_v19 = vld [vmem:[%s7459_s1 + $0x88] ss:$16 sps:$4 sm:$0xff]   ;;  %v4910_v20 = vld [vmem:[%s7459_s1 + $0xa4] ss:$16 sps:$4 sm:$0xff]  }
   0x8   :  { %1627 = vmatprep.subr.bf16.mxu0 %v4892_v8  ;;  %1791 = vmatprep.subr.bf16.mxu1 %v4894_v9  ;;  %v4912_v21 = vld [vmem:[%s7459_s1 + $0xac] ss:$16 sps:$4 sm:$0xff]   ;;  %v4914_v22 = vld [vmem:[%s7459_s1 + $0xa0] ss:$16 sps:$4 sm:$0xff]   ;;  %v4915_v23 = vld [vmem:[%s7459_s1 + $0xa8] ss:$16 sps:$4 sm:$0xff]  }
   0x9   :  { %v4916_v24 = vld [vmem:[%s7459_s1 + $0xc4] ss:$16 sps:$4 sm:$0xff]   ;;  %v4918_v25 = vld [vmem:[%s7459_s1 + $0xcc] ss:$16 sps:$4 sm:$0xff]   ;;  %v4920_v26 = vld [vmem:[%s7459_s1 + $0xc0] ss:$16 sps:$4 sm:$0xff]  }
   0xa   :  { %v4921_v27 = vld [vmem:[%s7459_s1 + $0xc8] ss:$16 sps:$4 sm:$0xff]   ;;  %v4922_v28 = vld [vmem:[%s7459_s1 + $0xe4] ss:$16 sps:$4 sm:$0xff]   ;;  %v4924_v29 = vld [vmem:[%s7459_s1 + $0xec] ss:$16 sps:$4 sm:$0xff]  }
   0xb   :  { %1628 = vmatpush1.bf16.msra.mxu0 %v4896_v10  ;;  %1792 = vmatpush1.bf16.msra.mxu1 %v4897_v11  ;;  %v4926_v30 = vld [vmem:[%s7459_s1 + $0xe0] ss:$16 sps:$4 sm:$0xff]   ;;  %v4927_v31 = vld [vmem:[%s7459_s1 + $0xe8] ss:$16 sps:$4 sm:$0xff]   ;;  %v4928_v32 = vld [vmem:[%s7459_s1 + $0x104] ss:$16 sps:$4 sm:$0xff]  }
   0xc   :  { %1629 = vmatprep.subr.bf16.mxu0 %v4898_v12  ;;  %1793 = vmatprep.subr.bf16.mxu1 %v4900_v13  ;;  %v4930_v33 = vld [vmem:[%s7459_s1 + $0x10c] ss:$16 sps:$4 sm:$0xff]   ;;  %v4932_v34 = vld [vmem:[%s7459_s1 + $0x100] ss:$16 sps:$4 sm:$0xff]   ;;  %v4933_v35 = vld [vmem:[%s7459_s1 + $0x108] ss:$16 sps:$4 sm:$0xff]  }
   0xd   :  { %v4934_v36 = vld [vmem:[%s7459_s1 + $0x124] ss:$16 sps:$4 sm:$0xff]   ;;  %v4936_v37 = vld [vmem:[%s7459_s1 + $0x12c] ss:$16 sps:$4 sm:$0xff]   ;;  %v4938_v38 = vld [vmem:[%s7459_s1 + $0x120] ss:$16 sps:$4 sm:$0xff]  }
   0xe   :  { %v4939_v39 = vld [vmem:[%s7459_s1 + $0x128] ss:$16 sps:$4 sm:$0xff]   ;;  %v4940_v40 = vld [vmem:[%s7459_s1 + $0x144] ss:$16 sps:$4 sm:$0xff]   ;;  %v4942_v41 = vld [vmem:[%s7459_s1 + $0x14c] ss:$16 sps:$4 sm:$0xff]  }
   0xf   :  { %1630 = vmatpush1.bf16.msra.mxu0 %v4902_v14  ;;  %1794 = vmatpush1.bf16.msra.mxu1 %v4903_v15  ;;  %v4944_v42 = vld [vmem:[%s7459_s1 + $0x140] ss:$16 sps:$4 sm:$0xff]   ;;  %v4945_v43 = vld [vmem:[%s7459_s1 + $0x148] ss:$16 sps:$4 sm:$0xff]   ;;  %v4946_v44 = vld [vmem:[%s7459_s1 + $0x164] ss:$16 sps:$4 sm:$0xff]  }
  0x10   :  { %1631 = vmatprep.subr.bf16.mxu0 %v4904_v16  ;;  %1795 = vmatprep.subr.bf16.mxu1 %v4906_v17  ;;  %v4948_v45 = vld [vmem:[%s7459_s1 + $0x16c] ss:$16 sps:$4 sm:$0xff]   ;;  %v33_v46 = vld [vmem:[%s7460_s0] sm:$0xff]  ;;  %v4951_v49 = vld [vmem:[%s7459_s1 + $0x168] ss:$16 sps:$4 sm:$0xff]  }
  0x11   :  { %v4950_v47 = vld [vmem:[%s7459_s1 + $0x160] ss:$16 sps:$4 sm:$0xff]   ;;  %v4232_v48 = vcombine.high %v33_v46, %v33_v46  ;;  %v4952_v50 = vld [vmem:[%s7459_s1 + $0x184] ss:$16 sps:$4 sm:$0xff]   ;;  %v4954_v51 = vld [vmem:[%s7459_s1 + $0x18c] ss:$16 sps:$4 sm:$0xff]   ;;  %v4231_v4 = vcombine.low %v33_v46, %v33_v46 }
  0x12   :  { %v4956_v52 = vld [vmem:[%s7459_s1 + $0x180] ss:$16 sps:$4 sm:$0xff]   ;;  %v4957_v53 = vld [vmem:[%s7459_s1 + $0x188] ss:$16 sps:$4 sm:$0xff]   ;;  %v4958_v54 = vld [vmem:[%s7459_s1 + $0x1a4] ss:$16 sps:$4 sm:$0xff]  }
  0x13   :  { %1632 = vmatpush1.bf16.msra.mxu0 %v4908_v18  ;;  %1796 = vmatpush1.bf16.msra.mxu1 %v4909_v19  ;;  %v4960_v55 = vld [vmem:[%s7459_s1 + $0x1ac] ss:$16 sps:$4 sm:$0xff]   ;;  %v4962_v56 = vld [vmem:[%s7459_s1 + $0x1a0] ss:$16 sps:$4 sm:$0xff]   ;;  %v4963_v57 = vld [vmem:[%s7459_s1 + $0x1a8] ss:$16 sps:$4 sm:$0xff]  }
  0x14   :  { %1633 = vmatprep.subr.bf16.mxu0 %v4910_v20  ;;  %1797 = vmatprep.subr.bf16.mxu1 %v4912_v21  ;;  %v4964_v58 = vld [vmem:[%s7459_s1 + $0x1c4] ss:$16 sps:$4 sm:$0xff]   ;;  %v4966_v59 = vld [vmem:[%s7459_s1 + $0x1cc] ss:$16 sps:$4 sm:$0xff]   ;;  %v4968_v60 = vld [vmem:[%s7459_s1 + $0x1c0] ss:$16 sps:$4 sm:$0xff]  }
  0x15   :  { %1655 = vmatprep.mubr.bf16.mxu0 %v4232_v48  ;;  %1819 = vmatprep.mubr.bf16.mxu1 %v4232_v48  ;;  %v4969_v61 = vld [vmem:[%s7459_s1 + $0x1c8] ss:$16 sps:$4 sm:$0xff]   ;;  %v4970_v62 = vld [vmem:[%s7459_s1 + $0x1e4] ss:$16 sps:$4 sm:$0xff]   ;;  %v4972_v63 = vld [vmem:[%s7459_s1 + $0x1ec] ss:$16 sps:$4 sm:$0xff]  }
  0x16   :  { %v4974_v0 = vld [vmem:[%s7459_s1 + $0x1e0] ss:$16 sps:$4 sm:$0xff]   ;;  %v4975_v1 = vld [vmem:[%s7459_s1 + $0x1e8] ss:$16 sps:$4 sm:$0xff]   ;;  %v4980_v2 = vld [vmem:[%s7459_s1 + $0x204] ss:$16 sps:$4 sm:$0xff]  }
  0x17   :  { %1634 = vmatpush1.bf16.msra.mxu0 %v4914_v22  ;;  %1798 = vmatpush1.bf16.msra.mxu1 %v4915_v23  ;;  %v4983_v3 = vld [vmem:[%s7459_s1 + $0x20c] ss:$16 sps:$4 sm:$0xff]   ;;  %v4978_v5 = vld [vmem:[%s7459_s1 + $0x200] ss:$16 sps:$4 sm:$0xff]   ;;  %v4981_v6 = vld [vmem:[%s7459_s1 + $0x208] ss:$16 sps:$4 sm:$0xff]  }
  0x18   :  { %1635 = vmatprep.subr.bf16.mxu0 %v4916_v24  ;;  %1799 = vmatprep.subr.bf16.mxu1 %v4918_v25  ;;  %v4986_v7 = vld [vmem:[%s7459_s1 + $0x224] ss:$16 sps:$4 sm:$0xff]   ;;  %v4989_v8 = vld [vmem:[%s7459_s1 + $0x22c] ss:$16 sps:$4 sm:$0xff]   ;;  %v4984_v9 = vld [vmem:[%s7459_s1 + $0x220] ss:$16 sps:$4 sm:$0xff]  }
  0x19   :  { %v4987_v10 = vld [vmem:[%s7459_s1 + $0x228] ss:$16 sps:$4 sm:$0xff]   ;;  %v4992_v11 = vld [vmem:[%s7459_s1 + $0x244] ss:$16 sps:$4 sm:$0xff]   ;;  %v4995_v12 = vld [vmem:[%s7459_s1 + $0x24c] ss:$16 sps:$4 sm:$0xff]  }
  0x1a   :  { %v4990_v13 = vld [vmem:[%s7459_s1 + $0x240] ss:$16 sps:$4 sm:$0xff]   ;;  %v4993_v14 = vld [vmem:[%s7459_s1 + $0x248] ss:$16 sps:$4 sm:$0xff]   ;;  %v4998_v15 = vld [vmem:[%s7459_s1 + $0x264] ss:$16 sps:$4 sm:$0xff]  }
  0x1b   :  { %1636 = vmatpush1.bf16.msra.mxu0 %v4920_v26  ;;  %1800 = vmatpush1.bf16.msra.mxu1 %v4921_v27  ;;  %v5001_v16 = vld [vmem:[%s7459_s1 + $0x26c] ss:$16 sps:$4 sm:$0xff]   ;;  %v4996_v17 = vld [vmem:[%s7459_s1 + $0x260] ss:$16 sps:$4 sm:$0xff]   ;;  %v4999_v18 = vld [vmem:[%s7459_s1 + $0x268] ss:$16 sps:$4 sm:$0xff]  }
  0x1c   :  { %1637 = vmatprep.subr.bf16.mxu0 %v4922_v28  ;;  %1801 = vmatprep.subr.bf16.mxu1 %v4924_v29  ;;  %v5004_v19 = vld [vmem:[%s7459_s1 + $0x284] ss:$16 sps:$4 sm:$0xff]   ;;  %v5007_v20 = vld [vmem:[%s7459_s1 + $0x28c] ss:$16 sps:$4 sm:$0xff]   ;;  %v5002_v21 = vld [vmem:[%s7459_s1 + $0x280] ss:$16 sps:$4 sm:$0xff]  }
  0x1d   :  { %v5005_v22 = vld [vmem:[%s7459_s1 + $0x288] ss:$16 sps:$4 sm:$0xff]   ;;  %v5010_v23 = vld [vmem:[%s7459_s1 + $0x2a4] ss:$16 sps:$4 sm:$0xff]   ;;  %v5013_v24 = vld [vmem:[%s7459_s1 + $0x2ac] ss:$16 sps:$4 sm:$0xff]  }
  0x1e   :  { %v5008_v25 = vld [vmem:[%s7459_s1 + $0x2a0] ss:$16 sps:$4 sm:$0xff]   ;;  %v5011_v26 = vld [vmem:[%s7459_s1 + $0x2a8] ss:$16 sps:$4 sm:$0xff]   ;;  %v5016_v27 = vld [vmem:[%s7459_s1 + $0x2c4] ss:$16 sps:$4 sm:$0xff]  }
  0x1f   :  { %1638 = vmatpush1.bf16.msra.mxu0 %v4926_v30  ;;  %1802 = vmatpush1.bf16.msra.mxu1 %v4927_v31  ;;  %v5019_v28 = vld [vmem:[%s7459_s1 + $0x2cc] ss:$16 sps:$4 sm:$0xff]   ;;  %v5014_v31 = vld [vmem:[%s7459_s1 + $0x2c0] ss:$16 sps:$4 sm:$0xff]   ;;  %v5041_v48 = vld [vmem:[%s7459_s1 + $0x348] ss:$16 sps:$4 sm:$0xff]  }
  0x20   :  { %1639 = vmatprep.subr.bf16.mxu0 %v4928_v32  ;;  %1803 = vmatprep.subr.bf16.mxu1 %v4930_v33  ;;  %v6014_v29 = vld [vmem:[%s7460_s0 + $0x8] sm:$0xff]  ;;  %v5022_v33 = vld [vmem:[%s7459_s1 + $0x2e4] ss:$16 sps:$4 sm:$0xff]  }
  0x21   :  { %v4234_v30 = vcombine.high %v6014_v29, %v6014_v29  ;;  %v5017_v32 = vld [vmem:[%s7459_s1 + $0x2c8] ss:$16 sps:$4 sm:$0xff]   ;;  %v5043_v46 = vld [vmem:[%s7459_s1 + $0x34c] ss:$16 sps:$4 sm:$0xff]  }
  0x23   :  { %1640 = vmatpush1.bf16.msra.mxu0 %v4932_v34  ;;  %1804 = vmatpush1.bf16.msra.mxu1 %v4933_v35  ;;  %v5025_v34 = vld [vmem:[%s7459_s1 + $0x2ec] ss:$16 sps:$4 sm:$0xff]   ;;  %v5020_v35 = vld [vmem:[%s7459_s1 + $0x2e0] ss:$16 sps:$4 sm:$0xff]  }
  0x24   :  { %1641 = vmatprep.subr.bf16.mxu0 %v4934_v36  ;;  %1805 = vmatprep.subr.bf16.mxu1 %v4936_v37  ;;  %v5023_v36 = vld [vmem:[%s7459_s1 + $0x2e8] ss:$16 sps:$4 sm:$0xff]   ;;  %v5028_v37 = vld [vmem:[%s7459_s1 + $0x304] ss:$16 sps:$4 sm:$0xff]  }
  0x27   :  { %1642 = vmatpush1.bf16.msra.mxu0 %v4938_v38  ;;  %1806 = vmatpush1.bf16.msra.mxu1 %v4939_v39  ;;  %v5031_v38 = vld [vmem:[%s7459_s1 + $0x30c] ss:$16 sps:$4 sm:$0xff]   ;;  %v5026_v39 = vld [vmem:[%s7459_s1 + $0x300] ss:$16 sps:$4 sm:$0xff]  }
  0x28   :  { %1643 = vmatprep.subr.bf16.mxu0 %v4940_v40  ;;  %1807 = vmatprep.subr.bf16.mxu1 %v4942_v41  ;;  %v5029_v40 = vld [vmem:[%s7459_s1 + $0x308] ss:$16 sps:$4 sm:$0xff]   ;;  %v5034_v41 = vld [vmem:[%s7459_s1 + $0x324] ss:$16 sps:$4 sm:$0xff]  }
  0x2b   :  { %1644 = vmatpush1.bf16.msra.mxu0 %v4944_v42  ;;  %1808 = vmatpush1.bf16.msra.mxu1 %v4945_v43  ;;  %v5037_v42 = vld [vmem:[%s7459_s1 + $0x32c] ss:$16 sps:$4 sm:$0xff]   ;;  %v5032_v43 = vld [vmem:[%s7459_s1 + $0x320] ss:$16 sps:$4 sm:$0xff]  }
  0x2c   :  { %1645 = vmatprep.subr.bf16.mxu0 %v4946_v44  ;;  %1809 = vmatprep.subr.bf16.mxu1 %v4948_v45  ;;  %v5035_v44 = vld [vmem:[%s7459_s1 + $0x328] ss:$16 sps:$4 sm:$0xff]   ;;  %v5040_v45 = vld [vmem:[%s7459_s1 + $0x344] ss:$16 sps:$4 sm:$0xff]  }
  0x2f   :  { %1646 = vmatpush1.bf16.msra.mxu0 %v4950_v47  ;;  %1810 = vmatpush1.bf16.msra.mxu1 %v4951_v49  ;;  %v5038_v47 = vld [vmem:[%s7459_s1 + $0x340] ss:$16 sps:$4 sm:$0xff]   ;;  %v5046_v49 = vld [vmem:[%s7459_s1 + $0x364] ss:$16 sps:$4 sm:$0xff]  }
  0x30   :  { %1647 = vmatprep.subr.bf16.mxu0 %v4952_v50  ;;  %1811 = vmatprep.subr.bf16.mxu1 %v4954_v51  ;;  %v5049_v50 = vld [vmem:[%s7459_s1 + $0x36c] ss:$16 sps:$4 sm:$0xff]   ;;  %v5044_v51 = vld [vmem:[%s7459_s1 + $0x360] ss:$16 sps:$4 sm:$0xff]  }
  0x33   :  { %1648 = vmatpush1.bf16.msra.mxu0 %v4956_v52  ;;  %1812 = vmatpush1.bf16.msra.mxu1 %v4957_v53  ;;  %v5047_v52 = vld [vmem:[%s7459_s1 + $0x368] ss:$16 sps:$4 sm:$0xff]   ;;  %v5052_v53 = vld [vmem:[%s7459_s1 + $0x384] ss:$16 sps:$4 sm:$0xff]  }
  0x34   :  { %1649 = vmatprep.subr.bf16.mxu0 %v4958_v54  ;;  %1813 = vmatprep.subr.bf16.mxu1 %v4960_v55  ;;  %v5055_v54 = vld [vmem:[%s7459_s1 + $0x38c] ss:$16 sps:$4 sm:$0xff]   ;;  %v5050_v55 = vld [vmem:[%s7459_s1 + $0x380] ss:$16 sps:$4 sm:$0xff]  }
  0x37   :  { %1650 = vmatpush1.bf16.msra.mxu0 %v4962_v56  ;;  %1814 = vmatpush1.bf16.msra.mxu1 %v4963_v57  ;;  %v5053_v56 = vld [vmem:[%s7459_s1 + $0x388] ss:$16 sps:$4 sm:$0xff]   ;;  %v5058_v57 = vld [vmem:[%s7459_s1 + $0x3a4] ss:$16 sps:$4 sm:$0xff]  }
  0x38   :  { %1651 = vmatprep.subr.bf16.mxu0 %v4964_v58  ;;  %1815 = vmatprep.subr.bf16.mxu1 %v4966_v59  ;;  %v5061_v58 = vld [vmem:[%s7459_s1 + $0x3ac] ss:$16 sps:$4 sm:$0xff]   ;;  %v5056_v59 = vld [vmem:[%s7459_s1 + $0x3a0] ss:$16 sps:$4 sm:$0xff]  }
  0x3b   :  { %1652 = vmatpush1.bf16.msra.mxu0 %v4968_v60  ;;  %1816 = vmatpush1.bf16.msra.mxu1 %v4969_v61  ;;  %v5059_v60 = vld [vmem:[%s7459_s1 + $0x3a8] ss:$16 sps:$4 sm:$0xff]   ;;  %v5064_v61 = vld [vmem:[%s7459_s1 + $0x3c4] ss:$16 sps:$4 sm:$0xff]  }
  0x3c   :  { %1653 = vmatprep.subr.bf16.mxu0 %v4970_v62  ;;  %1817 = vmatprep.subr.bf16.mxu1 %v4972_v63  ;;  %v5067_v62 = vld [vmem:[%s7459_s1 + $0x3cc] ss:$16 sps:$4 sm:$0xff]   ;;  %v5062_v63 = vld [vmem:[%s7459_s1 + $0x3c0] ss:$16 sps:$4 sm:$0xff]  }
  0x3f   :  { %1654 = vmatpush1.bf16.msra.mxu0 %v4974_v0  ;;  %1818 = vmatpush1.bf16.msra.mxu1 %v4975_v1  ;;  %v5065_v0 = vld [vmem:[%s7459_s1 + $0x3c8] ss:$16 sps:$4 sm:$0xff]   ;;  %v5070_v1 = vld [vmem:[%s7459_s1 + $0x3e4] ss:$16 sps:$4 sm:$0xff]  }
  0x40   :  { %1664 = vmatprep.subr.bf16.mxu0 %v4980_v2  ;;  %1828 = vmatprep.subr.bf16.mxu1 %v4983_v3  ;;  %v5073_v2 = vld [vmem:[%s7459_s1 + $0x3ec] ss:$16 sps:$4 sm:$0xff]   ;;  %v5068_v3 = vld [vmem:[%s7459_s1 + $0x3e0] ss:$16 sps:$4 sm:$0xff]  }
  0x42   :  { %1656 = vmatmul.mubr.bf16.vlgmr.msra.gmra.mrb[0].mxu0 %v4231_v4  ;;  %1820 = vmatmul.mubr.bf16.vlgmr.msra.gmra.mrb[0].mxu1 %v4231_v4  ;;  %v5071_v4 = vld [vmem:[%s7459_s1 + $0x3e8] ss:$16 sps:$4 sm:$0xff]  }
  0x43   :  { %1665 = vmatpush1.bf16.msra.mxu0 %v4978_v5  ;;  %1829 = vmatpush1.bf16.msra.mxu1 %v4981_v6  ;;  %v5078_v5 = vld [vmem:[%s7459_s1 + $0x404] ss:$16 sps:$4 sm:$0xff]   ;;  %v5081_v6 = vld [vmem:[%s7459_s1 + $0x40c] ss:$16 sps:$4 sm:$0xff]  }
  0x44   :  { %1666 = vmatprep.subr.bf16.mxu0 %v4986_v7  ;;  %1830 = vmatprep.subr.bf16.mxu1 %v4989_v8  ;;  %v4233_v7 = vcombine.low %v6014_v29, %v6014_v29  ;;  %v5076_v8 = vld [vmem:[%s7459_s1 + $0x400] ss:$16 sps:$4 sm:$0xff]   ;;  %v5111_v29 = vld [vmem:[%s7459_s1 + $0x4ac] ss:$16 sps:$4 sm:$0xff]  }
  0x45   :  { %1696 = vmatprep.mubr.bf16.mxu0 %v4234_v30  ;;  %1860 = vmatprep.mubr.bf16.mxu1 %v4234_v30  ;;  %v5106_v30 = vld [vmem:[%s7459_s1 + $0x4a0] ss:$16 sps:$4 sm:$0xff]  }
  0x47   :  { %1667 = vmatpush1.bf16.msra.mxu0 %v4984_v9  ;;  %1831 = vmatpush1.bf16.msra.mxu1 %v4987_v10  ;;  %v5079_v9 = vld [vmem:[%s7459_s1 + $0x408] ss:$16 sps:$4 sm:$0xff]   ;;  %v5084_v10 = vld [vmem:[%s7459_s1 + $0x424] ss:$16 sps:$4 sm:$0xff]  }
  0x48   :  { %1668 = vmatprep.subr.bf16.mxu0 %v4992_v11  ;;  %1832 = vmatprep.subr.bf16.mxu1 %v4995_v12  ;;  %v6152_v11 = vld [vmem:[%s7460_s0 + $0x10] sm:$0xff]  ;;  %v5087_v12 = vld [vmem:[%s7459_s1 + $0x42c] ss:$16 sps:$4 sm:$0xff]  }
  0x4b   :  { %1669 = vmatpush1.bf16.msra.mxu0 %v4990_v13  ;;  %1833 = vmatpush1.bf16.msra.mxu1 %v4993_v14  ;;  %v4236_v13 = vcombine.high %v6152_v11, %v6152_v11  ;;  %v5082_v14 = vld [vmem:[%s7459_s1 + $0x420] ss:$16 sps:$4 sm:$0xff]  }
  0x4c   :  { %1670 = vmatprep.subr.bf16.mxu0 %v4998_v15  ;;  %1834 = vmatprep.subr.bf16.mxu1 %v5001_v16  ;;  %v5085_v15 = vld [vmem:[%s7459_s1 + $0x428] ss:$16 sps:$4 sm:$0xff]   ;;  %v5090_v16 = vld [vmem:[%s7459_s1 + $0x444] ss:$16 sps:$4 sm:$0xff]  }
  0x4f   :  { %1671 = vmatpush1.bf16.msra.mxu0 %v4996_v17  ;;  %1835 = vmatpush1.bf16.msra.mxu1 %v4999_v18  ;;  %v5093_v17 = vld [vmem:[%s7459_s1 + $0x44c] ss:$16 sps:$4 sm:$0xff]   ;;  %v5088_v18 = vld [vmem:[%s7459_s1 + $0x440] ss:$16 sps:$4 sm:$0xff]  }
  0x50   :  { %1672 = vmatprep.subr.bf16.mxu0 %v5004_v19  ;;  %1836 = vmatprep.subr.bf16.mxu1 %v5007_v20  ;;  %v5091_v19 = vld [vmem:[%s7459_s1 + $0x448] ss:$16 sps:$4 sm:$0xff]   ;;  %v5096_v20 = vld [vmem:[%s7459_s1 + $0x464] ss:$16 sps:$4 sm:$0xff]  }
  0x53   :  { %1673 = vmatpush1.bf16.msra.mxu0 %v5002_v21  ;;  %1837 = vmatpush1.bf16.msra.mxu1 %v5005_v22  ;;  %v5099_v21 = vld [vmem:[%s7459_s1 + $0x46c] ss:$16 sps:$4 sm:$0xff]   ;;  %v5094_v22 = vld [vmem:[%s7459_s1 + $0x460] ss:$16 sps:$4 sm:$0xff]  }
  0x54   :  { %1674 = vmatprep.subr.bf16.mxu0 %v5010_v23  ;;  %1838 = vmatprep.subr.bf16.mxu1 %v5013_v24  ;;  %v5097_v23 = vld [vmem:[%s7459_s1 + $0x468] ss:$16 sps:$4 sm:$0xff]   ;;  %v5102_v24 = vld [vmem:[%s7459_s1 + $0x484] ss:$16 sps:$4 sm:$0xff]  }
  0x57   :  { %1675 = vmatpush1.bf16.msra.mxu0 %v5008_v25  ;;  %1839 = vmatpush1.bf16.msra.mxu1 %v5011_v26  ;;  %v5105_v25 = vld [vmem:[%s7459_s1 + $0x48c] ss:$16 sps:$4 sm:$0xff]   ;;  %v5100_v26 = vld [vmem:[%s7459_s1 + $0x480] ss:$16 sps:$4 sm:$0xff]  }
  0x58   :  { %1676 = vmatprep.subr.bf16.mxu0 %v5016_v27  ;;  %1840 = vmatprep.subr.bf16.mxu1 %v5019_v28  ;;  %v5103_v27 = vld [vmem:[%s7459_s1 + $0x488] ss:$16 sps:$4 sm:$0xff]   ;;  %v5108_v28 = vld [vmem:[%s7459_s1 + $0x4a4] ss:$16 sps:$4 sm:$0xff]  }
  0x5b   :  { %1677 = vmatpush1.bf16.msra.mxu0 %v5014_v31  ;;  %1841 = vmatpush1.bf16.msra.mxu1 %v5017_v32  ;;  %v5109_v31 = vld [vmem:[%s7459_s1 + $0x4a8] ss:$16 sps:$4 sm:$0xff]   ;;  %v5114_v32 = vld [vmem:[%s7459_s1 + $0x4c4] ss:$16 sps:$4 sm:$0xff]  }
  0x5c   :  { %1678 = vmatprep.subr.bf16.mxu0 %v5022_v33  ;;  %1842 = vmatprep.subr.bf16.mxu1 %v5025_v34  ;;  %v5117_v33 = vld [vmem:[%s7459_s1 + $0x4cc] ss:$16 sps:$4 sm:$0xff]   ;;  %v5112_v34 = vld [vmem:[%s7459_s1 + $0x4c0] ss:$16 sps:$4 sm:$0xff]  }
  0x5f   :  { %1679 = vmatpush1.bf16.msra.mxu0 %v5020_v35  ;;  %1843 = vmatpush1.bf16.msra.mxu1 %v5023_v36  ;;  %v5115_v35 = vld [vmem:[%s7459_s1 + $0x4c8] ss:$16 sps:$4 sm:$0xff]   ;;  %v5120_v36 = vld [vmem:[%s7459_s1 + $0x4e4] ss:$16 sps:$4 sm:$0xff]  }
  0x60   :  { %1680 = vmatprep.subr.bf16.mxu0 %v5028_v37  ;;  %1844 = vmatprep.subr.bf16.mxu1 %v5031_v38  ;;  %v5123_v37 = vld [vmem:[%s7459_s1 + $0x4ec] ss:$16 sps:$4 sm:$0xff]   ;;  %v5118_v38 = vld [vmem:[%s7459_s1 + $0x4e0] ss:$16 sps:$4 sm:$0xff]  }
  0x63   :  { %1681 = vmatpush1.bf16.msra.mxu0 %v5026_v39  ;;  %1845 = vmatpush1.bf16.msra.mxu1 %v5029_v40  ;;  %v5121_v39 = vld [vmem:[%s7459_s1 + $0x4e8] ss:$16 sps:$4 sm:$0xff]   ;;  %v5126_v40 = vld [vmem:[%s7459_s1 + $0x504] ss:$16 sps:$4 sm:$0xff]  }
  0x64   :  { %1682 = vmatprep.subr.bf16.mxu0 %v5034_v41  ;;  %1846 = vmatprep.subr.bf16.mxu1 %v5037_v42  ;;  %v5129_v41 = vld [vmem:[%s7459_s1 + $0x50c] ss:$16 sps:$4 sm:$0xff]   ;;  %v5124_v42 = vld [vmem:[%s7459_s1 + $0x500] ss:$16 sps:$4 sm:$0xff]  }
  0x67   :  { %1683 = vmatpush1.bf16.msra.mxu0 %v5032_v43  ;;  %1847 = vmatpush1.bf16.msra.mxu1 %v5035_v44  ;;  %v5127_v43 = vld [vmem:[%s7459_s1 + $0x508] ss:$16 sps:$4 sm:$0xff]   ;;  %v5132_v44 = vld [vmem:[%s7459_s1 + $0x524] ss:$16 sps:$4 sm:$0xff]  }
  0x68   :  { %1684 = vmatprep.subr.bf16.mxu0 %v5040_v45  ;;  %1848 = vmatprep.subr.bf16.mxu1 %v5043_v46  ;;  %v5135_v45 = vld [vmem:[%s7459_s1 + $0x52c] ss:$16 sps:$4 sm:$0xff]   ;;  %v5130_v46 = vld [vmem:[%s7459_s1 + $0x520] ss:$16 sps:$4 sm:$0xff]  }
  0x6b   :  { %1685 = vmatpush1.bf16.msra.mxu0 %v5038_v47  ;;  %1849 = vmatpush1.bf16.msra.mxu1 %v5041_v48  ;;  %v5133_v47 = vld [vmem:[%s7459_s1 + $0x528] ss:$16 sps:$4 sm:$0xff]   ;;  %v5138_v48 = vld [vmem:[%s7459_s1 + $0x544] ss:$16 sps:$4 sm:$0xff]  }
  0x6c   :  { %1686 = vmatprep.subr.bf16.mxu0 %v5046_v49  ;;  %1850 = vmatprep.subr.bf16.mxu1 %v5049_v50  ;;  %v5141_v49 = vld [vmem:[%s7459_s1 + $0x54c] ss:$16 sps:$4 sm:$0xff]   ;;  %v5136_v50 = vld [vmem:[%s7459_s1 + $0x540] ss:$16 sps:$4 sm:$0xff]  }
  0x6f   :  { %1687 = vmatpush1.bf16.msra.mxu0 %v5044_v51  ;;  %1851 = vmatpush1.bf16.msra.mxu1 %v5047_v52  ;;  %v5139_v51 = vld [vmem:[%s7459_s1 + $0x548] ss:$16 sps:$4 sm:$0xff]   ;;  %v5144_v52 = vld [vmem:[%s7459_s1 + $0x564] ss:$16 sps:$4 sm:$0xff]  }
  0x70   :  { %1688 = vmatprep.subr.bf16.mxu0 %v5052_v53  ;;  %1852 = vmatprep.subr.bf16.mxu1 %v5055_v54  ;;  %v5147_v53 = vld [vmem:[%s7459_s1 + $0x56c] ss:$16 sps:$4 sm:$0xff]   ;;  %v5142_v54 = vld [vmem:[%s7459_s1 + $0x560] ss:$16 sps:$4 sm:$0xff]  }
  0x73   :  { %1689 = vmatpush1.bf16.msra.mxu0 %v5050_v55  ;;  %1853 = vmatpush1.bf16.msra.mxu1 %v5053_v56  ;;  %v5145_v55 = vld [vmem:[%s7459_s1 + $0x568] ss:$16 sps:$4 sm:$0xff]   ;;  %v5150_v56 = vld [vmem:[%s7459_s1 + $0x584] ss:$16 sps:$4 sm:$0xff]  }
  0x74   :  { %1690 = vmatprep.subr.bf16.mxu0 %v5058_v57  ;;  %1854 = vmatprep.subr.bf16.mxu1 %v5061_v58  ;;  %v5153_v57 = vld [vmem:[%s7459_s1 + $0x58c] ss:$16 sps:$4 sm:$0xff]   ;;  %v5148_v58 = vld [vmem:[%s7459_s1 + $0x580] ss:$16 sps:$4 sm:$0xff]  }
  0x77   :  { %1691 = vmatpush1.bf16.msra.mxu0 %v5056_v59  ;;  %1855 = vmatpush1.bf16.msra.mxu1 %v5059_v60  ;;  %v5151_v59 = vld [vmem:[%s7459_s1 + $0x588] ss:$16 sps:$4 sm:$0xff]   ;;  %v5156_v60 = vld [vmem:[%s7459_s1 + $0x5a4] ss:$16 sps:$4 sm:$0xff]  }
  0x78   :  { %1692 = vmatprep.subr.bf16.mxu0 %v5064_v61  ;;  %1856 = vmatprep.subr.bf16.mxu1 %v5067_v62  ;;  %v5159_v61 = vld [vmem:[%s7459_s1 + $0x5ac] ss:$16 sps:$4 sm:$0xff]   ;;  %v5154_v62 = vld [vmem:[%s7459_s1 + $0x5a0] ss:$16 sps:$4 sm:$0xff]  }
  0x7b   :  { %1693 = vmatpush1.bf16.msra.mxu0 %v5062_v63  ;;  %1857 = vmatpush1.bf16.msra.mxu1 %v5065_v0  ;;  %v5157_v63 = vld [vmem:[%s7459_s1 + $0x5a8] ss:$16 sps:$4 sm:$0xff]   ;;  %v5162_v0 = vld [vmem:[%s7459_s1 + $0x5c4] ss:$16 sps:$4 sm:$0xff]  }
  0x7c   :  { %1694 = vmatprep.subr.bf16.mxu0 %v5070_v1  ;;  %1858 = vmatprep.subr.bf16.mxu1 %v5073_v2  ;;  %v5165_v1 = vld [vmem:[%s7459_s1 + $0x5cc] ss:$16 sps:$4 sm:$0xff]   ;;  %v5160_v2 = vld [vmem:[%s7459_s1 + $0x5c0] ss:$16 sps:$4 sm:$0xff]  }
  0x7f   :  { %1695 = vmatpush1.bf16.msra.mxu0 %v5068_v3  ;;  %1859 = vmatpush1.bf16.msra.mxu1 %v5071_v4  ;;  %v5163_v3 = vld [vmem:[%s7459_s1 + $0x5c8] ss:$16 sps:$4 sm:$0xff]   ;;  %v5168_v4 = vld [vmem:[%s7459_s1 + $0x5e4] ss:$16 sps:$4 sm:$0xff]  }
  0x80   :  { %1705 = vmatprep.subr.bf16.mxu0 %v5078_v5  ;;  %1869 = vmatprep.subr.bf16.mxu1 %v5081_v6  ;;  %v5171_v5 = vld [vmem:[%s7459_s1 + $0x5ec] ss:$16 sps:$4 sm:$0xff]   ;;  %v5166_v6 = vld [vmem:[%s7459_s1 + $0x5e0] ss:$16 sps:$4 sm:$0xff]  }
  0x82   :  { %1697 = vmatmul.mubr.bf16.vlgmr.msra.gmra.mrb[0].mxu0 %v4233_v7  ;;  %1861 = vmatmul.mubr.bf16.vlgmr.msra.gmra.mrb[0].mxu1 %v4233_v7  ;;  %v5169_v7 = vld [vmem:[%s7459_s1 + $0x5e8] ss:$16 sps:$4 sm:$0xff]  }
  0x83   :  { %1706 = vmatpush1.bf16.msra.mxu0 %v5076_v8  ;;  %1870 = vmatpush1.bf16.msra.mxu1 %v5079_v9  ;;  %v5176_v8 = vld [vmem:[%s7459_s1 + $0x604] ss:$16 sps:$4 sm:$0xff]   ;;  %v5179_v9 = vld [vmem:[%s7459_s1 + $0x60c] ss:$16 sps:$4 sm:$0xff]  }
  0x84   :  { %1707 = vmatprep.subr.bf16.mxu0 %v5084_v10  ;;  %1871 = vmatprep.subr.bf16.mxu1 %v5087_v12  ;;  %v5174_v10 = vld [vmem:[%s7459_s1 + $0x600] ss:$16 sps:$4 sm:$0xff]   ;;  %v4235_v12 = vcombine.low %v6152_v11, %v6152_v11  ;;  %v5185_v11 = vld [vmem:[%s7459_s1 + $0x62c] ss:$16 sps:$4 sm:$0xff]  }
  0x85   :  { %1737 = vmatprep.mubr.bf16.mxu0 %v4236_v13  ;;  %1901 = vmatprep.mubr.bf16.mxu1 %v4236_v13  ;;  %v5177_v13 = vld [vmem:[%s7459_s1 + $0x608] ss:$16 sps:$4 sm:$0xff]  }
  0x87   :  { %1708 = vmatpush1.bf16.msra.mxu0 %v5082_v14  ;;  %1872 = vmatpush1.bf16.msra.mxu1 %v5085_v15  ;;  %v6350_v14 = vld [vmem:[%s7460_s0 + $0x18] sm:$0xff]  ;;  %v5182_v15 = vld [vmem:[%s7459_s1 + $0x624] ss:$16 sps:$4 sm:$0xff]  }
  0x88   :  { %1709 = vmatprep.subr.bf16.mxu0 %v5090_v16  ;;  %1873 = vmatprep.subr.bf16.mxu1 %v5093_v17  ;;  %v4238_v16 = vcombine.high %v6350_v14, %v6350_v14  ;;  %v5180_v17 = vld [vmem:[%s7459_s1 + $0x620] ss:$16 sps:$4 sm:$0xff]  }
  0x8b   :  { %1710 = vmatpush1.bf16.msra.mxu0 %v5088_v18  ;;  %1874 = vmatpush1.bf16.msra.mxu1 %v5091_v19  ;;  %v5183_v18 = vld [vmem:[%s7459_s1 + $0x628] ss:$16 sps:$4 sm:$0xff]   ;;  %v5188_v19 = vld [vmem:[%s7459_s1 + $0x644] ss:$16 sps:$4 sm:$0xff]  }
  0x8c   :  { %1711 = vmatprep.subr.bf16.mxu0 %v5096_v20  ;;  %1875 = vmatprep.subr.bf16.mxu1 %v5099_v21  ;;  %v5191_v20 = vld [vmem:[%s7459_s1 + $0x64c] ss:$16 sps:$4 sm:$0xff]   ;;  %v5186_v21 = vld [vmem:[%s7459_s1 + $0x640] ss:$16 sps:$4 sm:$0xff]  }
  0x8f   :  { %1712 = vmatpush1.bf16.msra.mxu0 %v5094_v22  ;;  %1876 = vmatpush1.bf16.msra.mxu1 %v5097_v23  ;;  %v5189_v22 = vld [vmem:[%s7459_s1 + $0x648] ss:$16 sps:$4 sm:$0xff]   ;;  %v5194_v23 = vld [vmem:[%s7459_s1 + $0x664] ss:$16 sps:$4 sm:$0xff]  }
  0x90   :  { %1713 = vmatprep.subr.bf16.mxu0 %v5102_v24  ;;  %1877 = vmatprep.subr.bf16.mxu1 %v5105_v25  ;;  %v5197_v24 = vld [vmem:[%s7459_s1 + $0x66c] ss:$16 sps:$4 sm:$0xff]   ;;  %v5192_v25 = vld [vmem:[%s7459_s1 + $0x660] ss:$16 sps:$4 sm:$0xff]  }
  0x93   :  { %1714 = vmatpush1.bf16.msra.mxu0 %v5100_v26  ;;  %1878 = vmatpush1.bf16.msra.mxu1 %v5103_v27  ;;  %v5195_v26 = vld [vmem:[%s7459_s1 + $0x668] ss:$16 sps:$4 sm:$0xff]   ;;  %v5200_v27 = vld [vmem:[%s7459_s1 + $0x684] ss:$16 sps:$4 sm:$0xff]  }
  0x94   :  { %1715 = vmatprep.subr.bf16.mxu0 %v5108_v28  ;;  %1879 = vmatprep.subr.bf16.mxu1 %v5111_v29  ;;  %v5203_v28 = vld [vmem:[%s7459_s1 + $0x68c] ss:$16 sps:$4 sm:$0xff]   ;;  %v5198_v29 = vld [vmem:[%s7459_s1 + $0x680] ss:$16 sps:$4 sm:$0xff]  }
  0x97   :  { %1716 = vmatpush1.bf16.msra.mxu0 %v5106_v30  ;;  %1880 = vmatpush1.bf16.msra.mxu1 %v5109_v31  ;;  %v5201_v30 = vld [vmem:[%s7459_s1 + $0x688] ss:$16 sps:$4 sm:$0xff]   ;;  %v5206_v31 = vld [vmem:[%s7459_s1 + $0x6a4] ss:$16 sps:$4 sm:$0xff]  }
  0x98   :  { %1717 = vmatprep.subr.bf16.mxu0 %v5114_v32  ;;  %1881 = vmatprep.subr.bf16.mxu1 %v5117_v33  ;;  %v5209_v32 = vld [vmem:[%s7459_s1 + $0x6ac] ss:$16 sps:$4 sm:$0xff]   ;;  %v5204_v33 = vld [vmem:[%s7459_s1 + $0x6a0] ss:$16 sps:$4 sm:$0xff]  }
  0x9b   :  { %1718 = vmatpush1.bf16.msra.mxu0 %v5112_v34  ;;  %1882 = vmatpush1.bf16.msra.mxu1 %v5115_v35  ;;  %v5207_v34 = vld [vmem:[%s7459_s1 + $0x6a8] ss:$16 sps:$4 sm:$0xff]   ;;  %v5212_v35 = vld [vmem:[%s7459_s1 + $0x6c4] ss:$16 sps:$4 sm:$0xff]  }
  0x9c   :  { %1719 = vmatprep.subr.bf16.mxu0 %v5120_v36  ;;  %1883 = vmatprep.subr.bf16.mxu1 %v5123_v37  ;;  %v5215_v36 = vld [vmem:[%s7459_s1 + $0x6cc] ss:$16 sps:$4 sm:$0xff]   ;;  %v5210_v37 = vld [vmem:[%s7459_s1 + $0x6c0] ss:$16 sps:$4 sm:$0xff]  }
  0x9f   :  { %1720 = vmatpush1.bf16.msra.mxu0 %v5118_v38  ;;  %1884 = vmatpush1.bf16.msra.mxu1 %v5121_v39  ;;  %v5213_v38 = vld [vmem:[%s7459_s1 + $0x6c8] ss:$16 sps:$4 sm:$0xff]   ;;  %v5218_v39 = vld [vmem:[%s7459_s1 + $0x6e4] ss:$16 sps:$4 sm:$0xff]  }
  0xa0   :  { %1721 = vmatprep.subr.bf16.mxu0 %v5126_v40  ;;  %1885 = vmatprep.subr.bf16.mxu1 %v5129_v41  ;;  %v5221_v40 = vld [vmem:[%s7459_s1 + $0x6ec] ss:$16 sps:$4 sm:$0xff]   ;;  %v5216_v41 = vld [vmem:[%s7459_s1 + $0x6e0] ss:$16 sps:$4 sm:$0xff]  }
  0xa3   :  { %1722 = vmatpush1.bf16.msra.mxu0 %v5124_v42  ;;  %1886 = vmatpush1.bf16.msra.mxu1 %v5127_v43  ;;  %v5219_v42 = vld [vmem:[%s7459_s1 + $0x6e8] ss:$16 sps:$4 sm:$0xff]   ;;  %v5224_v43 = vld [vmem:[%s7459_s1 + $0x704] ss:$16 sps:$4 sm:$0xff]  }
  0xa4   :  { %1723 = vmatprep.subr.bf16.mxu0 %v5132_v44  ;;  %1887 = vmatprep.subr.bf16.mxu1 %v5135_v45  ;;  %v5227_v44 = vld [vmem:[%s7459_s1 + $0x70c] ss:$16 sps:$4 sm:$0xff]   ;;  %v5222_v45 = vld [vmem:[%s7459_s1 + $0x700] ss:$16 sps:$4 sm:$0xff]  }
  0xa7   :  { %1724 = vmatpush1.bf16.msra.mxu0 %v5130_v46  ;;  %1888 = vmatpush1.bf16.msra.mxu1 %v5133_v47  ;;  %v5225_v46 = vld [vmem:[%s7459_s1 + $0x708] ss:$16 sps:$4 sm:$0xff]   ;;  %v5230_v47 = vld [vmem:[%s7459_s1 + $0x724] ss:$16 sps:$4 sm:$0xff]  }
  0xa8   :  { %1725 = vmatprep.subr.bf16.mxu0 %v5138_v48  ;;  %1889 = vmatprep.subr.bf16.mxu1 %v5141_v49  ;;  %v5233_v48 = vld [vmem:[%s7459_s1 + $0x72c] ss:$16 sps:$4 sm:$0xff]   ;;  %v5228_v49 = vld [vmem:[%s7459_s1 + $0x720] ss:$16 sps:$4 sm:$0xff]  }
  0xab   :  { %1726 = vmatpush1.bf16.msra.mxu0 %v5136_v50  ;;  %1890 = vmatpush1.bf16.msra.mxu1 %v5139_v51  ;;  %v5231_v50 = vld [vmem:[%s7459_s1 + $0x728] ss:$16 sps:$4 sm:$0xff]   ;;  %v5236_v51 = vld [vmem:[%s7459_s1 + $0x744] ss:$16 sps:$4 sm:$0xff]  }
  0xac   :  { %1727 = vmatprep.subr.bf16.mxu0 %v5144_v52  ;;  %1891 = vmatprep.subr.bf16.mxu1 %v5147_v53  ;;  %v5239_v52 = vld [vmem:[%s7459_s1 + $0x74c] ss:$16 sps:$4 sm:$0xff]   ;;  %v5234_v53 = vld [vmem:[%s7459_s1 + $0x740] ss:$16 sps:$4 sm:$0xff]  }
  0xaf   :  { %1728 = vmatpush1.bf16.msra.mxu0 %v5142_v54  ;;  %1892 = vmatpush1.bf16.msra.mxu1 %v5145_v55  ;;  %v5237_v54 = vld [vmem:[%s7459_s1 + $0x748] ss:$16 sps:$4 sm:$0xff]   ;;  %v5242_v55 = vld [vmem:[%s7459_s1 + $0x764] ss:$16 sps:$4 sm:$0xff]  }
  0xb0   :  { %1729 = vmatprep.subr.bf16.mxu0 %v5150_v56  ;;  %1893 = vmatprep.subr.bf16.mxu1 %v5153_v57  ;;  %v5245_v56 = vld [vmem:[%s7459_s1 + $0x76c] ss:$16 sps:$4 sm:$0xff]   ;;  %v5240_v57 = vld [vmem:[%s7459_s1 + $0x760] ss:$16 sps:$4 sm:$0xff]  }
  0xb3   :  { %1730 = vmatpush1.bf16.msra.mxu0 %v5148_v58  ;;  %1894 = vmatpush1.bf16.msra.mxu1 %v5151_v59  ;;  %v5243_v58 = vld [vmem:[%s7459_s1 + $0x768] ss:$16 sps:$4 sm:$0xff]   ;;  %v5248_v59 = vld [vmem:[%s7459_s1 + $0x784] ss:$16 sps:$4 sm:$0xff]  }
  0xb4   :  { %1731 = vmatprep.subr.bf16.mxu0 %v5156_v60  ;;  %1895 = vmatprep.subr.bf16.mxu1 %v5159_v61  ;;  %v5251_v60 = vld [vmem:[%s7459_s1 + $0x78c] ss:$16 sps:$4 sm:$0xff]   ;;  %v5246_v61 = vld [vmem:[%s7459_s1 + $0x780] ss:$16 sps:$4 sm:$0xff]  }
  0xb7   :  { %1732 = vmatpush1.bf16.msra.mxu0 %v5154_v62  ;;  %1896 = vmatpush1.bf16.msra.mxu1 %v5157_v63  ;;  %v5249_v62 = vld [vmem:[%s7459_s1 + $0x788] ss:$16 sps:$4 sm:$0xff]   ;;  %v5254_v63 = vld [vmem:[%s7459_s1 + $0x7a4] ss:$16 sps:$4 sm:$0xff]  }
  0xb8   :  { %1733 = vmatprep.subr.bf16.mxu0 %v5162_v0  ;;  %1897 = vmatprep.subr.bf16.mxu1 %v5165_v1  ;;  %v5257_v0 = vld [vmem:[%s7459_s1 + $0x7ac] ss:$16 sps:$4 sm:$0xff]   ;;  %v5252_v1 = vld [vmem:[%s7459_s1 + $0x7a0] ss:$16 sps:$4 sm:$0xff]  }
  0xbb   :  { %1734 = vmatpush1.bf16.msra.mxu0 %v5160_v2  ;;  %1898 = vmatpush1.bf16.msra.mxu1 %v5163_v3  ;;  %v5255_v2 = vld [vmem:[%s7459_s1 + $0x7a8] ss:$16 sps:$4 sm:$0xff]   ;;  %v5260_v3 = vld [vmem:[%s7459_s1 + $0x7c4] ss:$16 sps:$4 sm:$0xff]  }
  0xbc   :  { %1735 = vmatprep.subr.bf16.mxu0 %v5168_v4  ;;  %1899 = vmatprep.subr.bf16.mxu1 %v5171_v5  ;;  %v5263_v4 = vld [vmem:[%s7459_s1 + $0x7cc] ss:$16 sps:$4 sm:$0xff]   ;;  %v5258_v5 = vld [vmem:[%s7459_s1 + $0x7c0] ss:$16 sps:$4 sm:$0xff]  }
  0xbf   :  { %1736 = vmatpush1.bf16.msra.mxu0 %v5166_v6  ;;  %1900 = vmatpush1.bf16.msra.mxu1 %v5169_v7  ;;  %v5261_v6 = vld [vmem:[%s7459_s1 + $0x7c8] ss:$16 sps:$4 sm:$0xff]   ;;  %v5266_v7 = vld [vmem:[%s7459_s1 + $0x7e4] ss:$16 sps:$4 sm:$0xff]  }
  0xc0   :  { %1746 = vmatprep.subr.bf16.mxu0 %v5176_v8  ;;  %1910 = vmatprep.subr.bf16.mxu1 %v5179_v9  ;;  %v5269_v8 = vld [vmem:[%s7459_s1 + $0x7ec] ss:$16 sps:$4 sm:$0xff]   ;;  %v5264_v9 = vld [vmem:[%s7459_s1 + $0x7e0] ss:$16 sps:$4 sm:$0xff]  }
  0xc2   :  { %1738 = vmatmul.mubr.bf16.vlgmr.msra.gmra.mrb[0].mxu0 %v4235_v12  ;;  %1902 = vmatmul.mubr.bf16.vlgmr.msra.gmra.mrb[0].mxu1 %v4235_v12  ;;  %v5274_v12 = vld [vmem:[%s7461_s3 + $0x4] ss:$16 sps:$4 sm:$0xff]  }
  0xc3   :  { %1747 = vmatpush1.bf16.msra.mxu0 %v5174_v10  ;;  %1911 = vmatpush1.bf16.msra.mxu1 %v5177_v13  ;;  %v5267_v10 = vld [vmem:[%s7459_s1 + $0x7e8] ss:$16 sps:$4 sm:$0xff]   ;;  %v5277_v13 = vld [vmem:[%s7461_s3 + $0xc] ss:$16 sps:$4 sm:$0xff]  }
  0xc4   :  { %1748 = vmatprep.subr.bf16.mxu0 %v5182_v15  ;;  %1912 = vmatprep.subr.bf16.mxu1 %v5185_v11  ;;  %v4237_v15 = vcombine.low %v6350_v14, %v6350_v14  ;;  %v5272_v11 = vld [vmem:[%s7461_s3] ss:$16 sps:$4 sm:$0xff]   ;;  %v5283_v14 = vld [vmem:[%s7461_s3 + $0x2c] ss:$16 sps:$4 sm:$0xff]  }
  0xc5   :  { %1778 = vmatprep.mubr.bf16.mxu0 %v4238_v16  ;;  %1942 = vmatprep.mubr.bf16.mxu1 %v4238_v16  ;;  %v5275_v16 = vld [vmem:[%s7461_s3 + $0x8] ss:$16 sps:$4 sm:$0xff]  }
  0xc7   :  { %1749 = vmatpush1.bf16.msra.mxu0 %v5180_v17  ;;  %1913 = vmatpush1.bf16.msra.mxu1 %v5183_v18  ;;  %v5280_v17 = vld [vmem:[%s7461_s3 + $0x24] ss:$16 sps:$4 sm:$0xff]   ;;  %v5278_v18 = vld [vmem:[%s7461_s3 + $0x20] ss:$16 sps:$4 sm:$0xff]  }
  0xc8   :  { %1750 = vmatprep.subr.bf16.mxu0 %v5188_v19  ;;  %1914 = vmatprep.subr.bf16.mxu1 %v5191_v20  ;;  %v5281_v19 = vld [vmem:[%s7461_s3 + $0x28] ss:$16 sps:$4 sm:$0xff]   ;;  %v5286_v20 = vld [vmem:[%s7461_s3 + $0x44] ss:$16 sps:$4 sm:$0xff]  }
  0xcb   :  { %1751 = vmatpush1.bf16.msra.mxu0 %v5186_v21  ;;  %1915 = vmatpush1.bf16.msra.mxu1 %v5189_v22  ;;  %v5289_v21 = vld [vmem:[%s7461_s3 + $0x4c] ss:$16 sps:$4 sm:$0xff]   ;;  %v5284_v22 = vld [vmem:[%s7461_s3 + $0x40] ss:$16 sps:$4 sm:$0xff]  }
  0xcc   :  { %1752 = vmatprep.subr.bf16.mxu0 %v5194_v23  ;;  %1916 = vmatprep.subr.bf16.mxu1 %v5197_v24  ;;  %v5287_v23 = vld [vmem:[%s7461_s3 + $0x48] ss:$16 sps:$4 sm:$0xff]   ;;  %v5292_v24 = vld [vmem:[%s7461_s3 + $0x64] ss:$16 sps:$4 sm:$0xff]  }
  0xcf   :  { %1753 = vmatpush1.bf16.msra.mxu0 %v5192_v25  ;;  %1917 = vmatpush1.bf16.msra.mxu1 %v5195_v26  ;;  %v5295_v25 = vld [vmem:[%s7461_s3 + $0x6c] ss:$16 sps:$4 sm:$0xff]   ;;  %v5290_v26 = vld [vmem:[%s7461_s3 + $0x60] ss:$16 sps:$4 sm:$0xff]  }
  0xd0   :  { %1754 = vmatprep.subr.bf16.mxu0 %v5200_v27  ;;  %1918 = vmatprep.subr.bf16.mxu1 %v5203_v28  ;;  %v5293_v27 = vld [vmem:[%s7461_s3 + $0x68] ss:$16 sps:$4 sm:$0xff]   ;;  %v5298_v28 = vld [vmem:[%s7461_s3 + $0x84] ss:$16 sps:$4 sm:$0xff]  }
  0xd3   :  { %1755 = vmatpush1.bf16.msra.mxu0 %v5198_v29  ;;  %1919 = vmatpush1.bf16.msra.mxu1 %v5201_v30  ;;  %v5301_v29 = vld [vmem:[%s7461_s3 + $0x8c] ss:$16 sps:$4 sm:$0xff]   ;;  %v5296_v30 = vld [vmem:[%s7461_s3 + $0x80] ss:$16 sps:$4 sm:$0xff]  }
  0xd4   :  { %1756 = vmatprep.subr.bf16.mxu0 %v5206_v31  ;;  %1920 = vmatprep.subr.bf16.mxu1 %v5209_v32  ;;  %v5299_v31 = vld [vmem:[%s7461_s3 + $0x88] ss:$16 sps:$4 sm:$0xff]   ;;  %v5304_v32 = vld [vmem:[%s7461_s3 + $0xa4] ss:$16 sps:$4 sm:$0xff]  }
  0xd7   :  { %1757 = vmatpush1.bf16.msra.mxu0 %v5204_v33  ;;  %1921 = vmatpush1.bf16.msra.mxu1 %v5207_v34  ;;  %v5307_v33 = vld [vmem:[%s7461_s3 + $0xac] ss:$16 sps:$4 sm:$0xff]   ;;  %v5302_v34 = vld [vmem:[%s7461_s3 + $0xa0] ss:$16 sps:$4 sm:$0xff]  }
  0xd8   :  { %1758 = vmatprep.subr.bf16.mxu0 %v5212_v35  ;;  %1922 = vmatprep.subr.bf16.mxu1 %v5215_v36  ;;  %v5305_v35 = vld [vmem:[%s7461_s3 + $0xa8] ss:$16 sps:$4 sm:$0xff]   ;;  %v5310_v36 = vld [vmem:[%s7461_s3 + $0xc4] ss:$16 sps:$4 sm:$0xff]  }
  0xdb   :  { %1759 = vmatpush1.bf16.msra.mxu0 %v5210_v37  ;;  %1923 = vmatpush1.bf16.msra.mxu1 %v5213_v38  ;;  %v5313_v37 = vld [vmem:[%s7461_s3 + $0xcc] ss:$16 sps:$4 sm:$0xff]   ;;  %v5308_v38 = vld [vmem:[%s7461_s3 + $0xc0] ss:$16 sps:$4 sm:$0xff]  }
  0xdc   :  { %1760 = vmatprep.subr.bf16.mxu0 %v5218_v39  ;;  %1924 = vmatprep.subr.bf16.mxu1 %v5221_v40  ;;  %v5311_v39 = vld [vmem:[%s7461_s3 + $0xc8] ss:$16 sps:$4 sm:$0xff]   ;;  %v5316_v40 = vld [vmem:[%s7461_s3 + $0xe4] ss:$16 sps:$4 sm:$0xff]  }
  0xdf   :  { %1761 = vmatpush1.bf16.msra.mxu0 %v5216_v41  ;;  %1925 = vmatpush1.bf16.msra.mxu1 %v5219_v42  ;;  %v5319_v41 = vld [vmem:[%s7461_s3 + $0xec] ss:$16 sps:$4 sm:$0xff]   ;;  %v5314_v42 = vld [vmem:[%s7461_s3 + $0xe0] ss:$16 sps:$4 sm:$0xff]  }
  0xe0   :  { %1762 = vmatprep.subr.bf16.mxu0 %v5224_v43  ;;  %1926 = vmatprep.subr.bf16.mxu1 %v5227_v44  ;;  %v5317_v43 = vld [vmem:[%s7461_s3 + $0xe8] ss:$16 sps:$4 sm:$0xff]   ;;  %v5322_v44 = vld [vmem:[%s7461_s3 + $0x104] ss:$16 sps:$4 sm:$0xff]  }
  0xe3   :  { %1763 = vmatpush1.bf16.msra.mxu0 %v5222_v45  ;;  %1927 = vmatpush1.bf16.msra.mxu1 %v5225_v46  ;;  %v5325_v45 = vld [vmem:[%s7461_s3 + $0x10c] ss:$16 sps:$4 sm:$0xff]   ;;  %v5320_v46 = vld [vmem:[%s7461_s3 + $0x100] ss:$16 sps:$4 sm:$0xff]  }
  0xe4   :  { %1764 = vmatprep.subr.bf16.mxu0 %v5230_v47  ;;  %1928 = vmatprep.subr.bf16.mxu1 %v5233_v48  ;;  %v5323_v47 = vld [vmem:[%s7461_s3 + $0x108] ss:$16 sps:$4 sm:$0xff]   ;;  %v5328_v48 = vld [vmem:[%s7461_s3 + $0x124] ss:$16 sps:$4 sm:$0xff]  }
  0xe7   :  { %1765 = vmatpush1.bf16.msra.mxu0 %v5228_v49  ;;  %1929 = vmatpush1.bf16.msra.mxu1 %v5231_v50  ;;  %v5331_v49 = vld [vmem:[%s7461_s3 + $0x12c] ss:$16 sps:$4 sm:$0xff]   ;;  %v5326_v50 = vld [vmem:[%s7461_s3 + $0x120] ss:$16 sps:$4 sm:$0xff]  }
  0xe8   :  { %1766 = vmatprep.subr.bf16.mxu0 %v5236_v51  ;;  %1930 = vmatprep.subr.bf16.mxu1 %v5239_v52  ;;  %v5329_v51 = vld [vmem:[%s7461_s3 + $0x128] ss:$16 sps:$4 sm:$0xff]   ;;  %v5334_v52 = vld [vmem:[%s7461_s3 + $0x144] ss:$16 sps:$4 sm:$0xff]  }
  0xeb   :  { %1767 = vmatpush1.bf16.msra.mxu0 %v5234_v53  ;;  %1931 = vmatpush1.bf16.msra.mxu1 %v5237_v54  ;;  %v5337_v53 = vld [vmem:[%s7461_s3 + $0x14c] ss:$16 sps:$4 sm:$0xff]   ;;  %v5332_v54 = vld [vmem:[%s7461_s3 + $0x140] ss:$16 sps:$4 sm:$0xff]  }
  0xec   :  { %1768 = vmatprep.subr.bf16.mxu0 %v5242_v55  ;;  %1932 = vmatprep.subr.bf16.mxu1 %v5245_v56  ;;  %v5335_v55 = vld [vmem:[%s7461_s3 + $0x148] ss:$16 sps:$4 sm:$0xff]   ;;  %v5340_v56 = vld [vmem:[%s7461_s3 + $0x164] ss:$16 sps:$4 sm:$0xff]  }
  0xef   :  { %1769 = vmatpush1.bf16.msra.mxu0 %v5240_v57  ;;  %1933 = vmatpush1.bf16.msra.mxu1 %v5243_v58  ;;  %v5343_v57 = vld [vmem:[%s7461_s3 + $0x16c] ss:$16 sps:$4 sm:$0xff]   ;;  %v5338_v58 = vld [vmem:[%s7461_s3 + $0x160] ss:$16 sps:$4 sm:$0xff]  }
  0xf0   :  { %1770 = vmatprep.subr.bf16.mxu0 %v5248_v59  ;;  %1934 = vmatprep.subr.bf16.mxu1 %v5251_v60  ;;  %v5341_v59 = vld [vmem:[%s7461_s3 + $0x168] ss:$16 sps:$4 sm:$0xff]   ;;  %v5346_v60 = vld [vmem:[%s7461_s3 + $0x184] ss:$16 sps:$4 sm:$0xff]  }
  0xf3   :  { %1771 = vmatpush1.bf16.msra.mxu0 %v5246_v61  ;;  %1935 = vmatpush1.bf16.msra.mxu1 %v5249_v62  ;;  %v5349_v61 = vld [vmem:[%s7461_s3 + $0x18c] ss:$16 sps:$4 sm:$0xff]   ;;  %v5344_v62 = vld [vmem:[%s7461_s3 + $0x180] ss:$16 sps:$4 sm:$0xff]  }
  0xf4   :  { %1772 = vmatprep.subr.bf16.mxu0 %v5254_v63  ;;  %1936 = vmatprep.subr.bf16.mxu1 %v5257_v0  ;;  %v5347_v63 = vld [vmem:[%s7461_s3 + $0x188] ss:$16 sps:$4 sm:$0xff]   ;;  %v5352_v0 = vld [vmem:[%s7461_s3 + $0x1a4] ss:$16 sps:$4 sm:$0xff]  }
  0xf7   :  { %1773 = vmatpush1.bf16.msra.mxu0 %v5252_v1  ;;  %1937 = vmatpush1.bf16.msra.mxu1 %v5255_v2  ;;  %v5355_v1 = vld [vmem:[%s7461_s3 + $0x1ac] ss:$16 sps:$4 sm:$0xff]   ;;  %v5350_v2 = vld [vmem:[%s7461_s3 + $0x1a0] ss:$16 sps:$4 sm:$0xff]  }
  0xf8   :  { %1774 = vmatprep.subr.bf16.mxu0 %v5260_v3  ;;  %1938 = vmatprep.subr.bf16.mxu1 %v5263_v4  ;;  %v5353_v3 = vld [vmem:[%s7461_s3 + $0x1a8] ss:$16 sps:$4 sm:$0xff]   ;;  %v5358_v4 = vld [vmem:[%s7461_s3 + $0x1c4] ss:$16 sps:$4 sm:$0xff]  }
  0xfb   :  { %1775 = vmatpush1.bf16.msra.mxu0 %v5258_v5  ;;  %1939 = vmatpush1.bf16.msra.mxu1 %v5261_v6  ;;  %v5361_v5 = vld [vmem:[%s7461_s3 + $0x1cc] ss:$16 sps:$4 sm:$0xff]   ;;  %v5356_v6 = vld [vmem:[%s7461_s3 + $0x1c0] ss:$16 sps:$4 sm:$0xff]  }
  0xfc   :  { %1776 = vmatprep.subr.bf16.mxu0 %v5266_v7  ;;  %1940 = vmatprep.subr.bf16.mxu1 %v5269_v8  ;;  %v5359_v7 = vld [vmem:[%s7461_s3 + $0x1c8] ss:$16 sps:$4 sm:$0xff]   ;;  %v5364_v8 = vld [vmem:[%s7461_s3 + $0x1e4] ss:$16 sps:$4 sm:$0xff]  }
  0xff   :  { %1777 = vmatpush1.bf16.msra.mxu0 %v5264_v9  ;;  %1941 = vmatpush1.bf16.msra.mxu1 %v5267_v10  ;;  %v5367_v9 = vld [vmem:[%s7461_s3 + $0x1ec] ss:$16 sps:$4 sm:$0xff]   ;;  %v5362_v10 = vld [vmem:[%s7461_s3 + $0x1e0] ss:$16 sps:$4 sm:$0xff]  }
 0x100   :  { %2749 = vmatprep.subr.bf16.mxu0 %v5274_v12  ;;  %2831 = vmatprep.subr.bf16.mxu1 %v5277_v13  ;;  %v5365_v12 = vld [vmem:[%s7461_s3 + $0x1e8] ss:$16 sps:$4 sm:$0xff]   ;;  %v5370_v13 = vld [vmem:[%s7461_s3 + $0x204] ss:$16 sps:$4 sm:$0xff]  }
 0x102   :  { %1779 = vmatmul.mubr.bf16.vlgmr.msra.gmra.mrb[0].mxu0 %v4237_v15  ;;  %1943 = vmatmul.mubr.bf16.vlgmr.msra.gmra.mrb[0].mxu1 %v4237_v15  ;;  %v5373_v15 = vld [vmem:[%s7461_s3 + $0x20c] ss:$16 sps:$4 sm:$0xff]  }
 0x103   :  { %2750 = vmatpush1.bf16.msra.mxu0 %v5272_v11  ;;  %2832 = vmatpush1.bf16.msra.mxu1 %v5275_v16  ;;  %v295_v11 = vlaneseq }
 0x104   :  { %2751 = vmatprep.subr.bf16.mxu0 %v5280_v17  ;;  %2833 = vmatprep.subr.bf16.mxu1 %v5283_v14  ;;  %v6742_v14 = vld [vmem:[%s7463_s2] sm:$0xf] }
 0x105   :  { %v6734_v16 = vshrl.u32 %v295_v11, 7  ;;  %v5430_v11 = vld [vmem:[%s7461_s3 + $0x344] ss:$16 sps:$4 sm:$0xff]  }
 0x107   :  { %2752 = vmatpush1.bf16.msra.mxu0 %v5278_v18  ;;  %2834 = vmatpush1.bf16.msra.mxu1 %v5281_v19  ;;  %v6737_v17 = vsub.s32 0, %v6734_v16  ;;  %v6745_v18 = vsub.s32 1, %v6734_v16  ;;  %v6748_v19 = vsub.s32 3, %v6734_v16 }
 0x108   :  { %2753 = vmatprep.subr.bf16.mxu0 %v5286_v20  ;;  %2835 = vmatprep.subr.bf16.mxu1 %v5289_v21 }
 0x109   :  { %v298_v20 = vrot.slane %v6742_v14, %v6737_v17  ;;  %v302_v21 = vrot.slane %v6742_v14, %v6745_v18 }
 0x10b   :  { %2754 = vmatpush1.bf16.msra.mxu0 %v5284_v22  ;;  %2836 = vmatpush1.bf16.msra.mxu1 %v5287_v23  ;;  %v310_v22 = vrot.slane %v6742_v14, %v6748_v19 }
 0x10c   :  { %2755 = vmatprep.subr.bf16.mxu0 %v5292_v24  ;;  %2837 = vmatprep.subr.bf16.mxu1 %v5295_v25 }
 0x10f   :  { %2756 = vmatpush1.bf16.msra.mxu0 %v5290_v26  ;;  %2838 = vmatpush1.bf16.msra.mxu1 %v5293_v27 }
 0x110   :  { %2757 = vmatprep.subr.bf16.mxu0 %v5298_v28  ;;  %2839 = vmatprep.subr.bf16.mxu1 %v5301_v29 }
 0x113   :  { %2758 = vmatpush1.bf16.msra.mxu0 %v5296_v30  ;;  %2840 = vmatpush1.bf16.msra.mxu1 %v5299_v31 }
 0x114   :  { %2759 = vmatprep.subr.bf16.mxu0 %v5304_v32  ;;  %2841 = vmatprep.subr.bf16.mxu1 %v5307_v33 }
 0x117   :  { %2760 = vmatpush1.bf16.msra.mxu0 %v5302_v34  ;;  %2842 = vmatpush1.bf16.msra.mxu1 %v5305_v35 }
 0x118   :  { %2761 = vmatprep.subr.bf16.mxu0 %v5310_v36  ;;  %2843 = vmatprep.subr.bf16.mxu1 %v5313_v37  ;;  %v5368_v36 = vld [vmem:[%s7461_s3 + $0x200] ss:$16 sps:$4 sm:$0xff]   ;;  %v5371_v37 = vld [vmem:[%s7461_s3 + $0x208] ss:$16 sps:$4 sm:$0xff]  }
 0x11b   :  { %2762 = vmatpush1.bf16.msra.mxu0 %v5308_v38  ;;  %2844 = vmatpush1.bf16.msra.mxu1 %v5311_v39 }
 0x11c   :  { %2763 = vmatprep.subr.bf16.mxu0 %v5316_v40  ;;  %2845 = vmatprep.subr.bf16.mxu1 %v5319_v41  ;;  %v5376_v41 = vld [vmem:[%s7461_s3 + $0x224] ss:$16 sps:$4 sm:$0xff]  }
 0x11f   :  { %2764 = vmatpush1.bf16.msra.mxu0 %v5314_v42  ;;  %2846 = vmatpush1.bf16.msra.mxu1 %v5317_v43  ;;  %v5379_v42 = vld [vmem:[%s7461_s3 + $0x22c] ss:$16 sps:$4 sm:$0xff]  }
 0x120   :  { %2765 = vmatprep.subr.bf16.mxu0 %v5322_v44  ;;  %2847 = vmatprep.subr.bf16.mxu1 %v5325_v45  ;;  %v5374_v44 = vld [vmem:[%s7461_s3 + $0x220] ss:$16 sps:$4 sm:$0xff]   ;;  %v5377_v45 = vld [vmem:[%s7461_s3 + $0x228] ss:$16 sps:$4 sm:$0xff]  }
 0x123   :  { %2766 = vmatpush1.bf16.msra.mxu0 %v5320_v46  ;;  %2848 = vmatpush1.bf16.msra.mxu1 %v5323_v47  ;;  %v5382_v46 = vld [vmem:[%s7461_s3 + $0x244] ss:$16 sps:$4 sm:$0xff]   ;;  %v5385_v47 = vld [vmem:[%s7461_s3 + $0x24c] ss:$16 sps:$4 sm:$0xff]  }
 0x124   :  { %2767 = vmatprep.subr.bf16.mxu0 %v5328_v48  ;;  %2849 = vmatprep.subr.bf16.mxu1 %v5331_v49  ;;  %v5380_v48 = vld [vmem:[%s7461_s3 + $0x240] ss:$16 sps:$4 sm:$0xff]   ;;  %v5383_v49 = vld [vmem:[%s7461_s3 + $0x248] ss:$16 sps:$4 sm:$0xff]  }
 0x127   :  { %2768 = vmatpush1.bf16.msra.mxu0 %v5326_v50  ;;  %2850 = vmatpush1.bf16.msra.mxu1 %v5329_v51  ;;  %v5388_v50 = vld [vmem:[%s7461_s3 + $0x264] ss:$16 sps:$4 sm:$0xff]   ;;  %v5391_v51 = vld [vmem:[%s7461_s3 + $0x26c] ss:$16 sps:$4 sm:$0xff]  }
 0x128   :  { %2769 = vmatprep.subr.bf16.mxu0 %v5334_v52  ;;  %2851 = vmatprep.subr.bf16.mxu1 %v5337_v53  ;;  %v5386_v52 = vld [vmem:[%s7461_s3 + $0x260] ss:$16 sps:$4 sm:$0xff]   ;;  %v5389_v53 = vld [vmem:[%s7461_s3 + $0x268] ss:$16 sps:$4 sm:$0xff]  }
 0x12b   :  { %2770 = vmatpush1.bf16.msra.mxu0 %v5332_v54  ;;  %2852 = vmatpush1.bf16.msra.mxu1 %v5335_v55  ;;  %v5394_v54 = vld [vmem:[%s7461_s3 + $0x284] ss:$16 sps:$4 sm:$0xff]   ;;  %v5397_v55 = vld [vmem:[%s7461_s3 + $0x28c] ss:$16 sps:$4 sm:$0xff]  }
 0x12c   :  { %2771 = vmatprep.subr.bf16.mxu0 %v5340_v56  ;;  %2853 = vmatprep.subr.bf16.mxu1 %v5343_v57  ;;  %v5392_v56 = vld [vmem:[%s7461_s3 + $0x280] ss:$16 sps:$4 sm:$0xff]   ;;  %v5395_v57 = vld [vmem:[%s7461_s3 + $0x288] ss:$16 sps:$4 sm:$0xff]  }
 0x12f   :  { %2772 = vmatpush1.bf16.msra.mxu0 %v5338_v58  ;;  %2854 = vmatpush1.bf16.msra.mxu1 %v5341_v59  ;;  %v5400_v58 = vld [vmem:[%s7461_s3 + $0x2a4] ss:$16 sps:$4 sm:$0xff]   ;;  %v5403_v59 = vld [vmem:[%s7461_s3 + $0x2ac] ss:$16 sps:$4 sm:$0xff]  }
 0x130   :  { %2773 = vmatprep.subr.bf16.mxu0 %v5346_v60  ;;  %2855 = vmatprep.subr.bf16.mxu1 %v5349_v61  ;;  %v5398_v60 = vld [vmem:[%s7461_s3 + $0x2a0] ss:$16 sps:$4 sm:$0xff]   ;;  %v5401_v61 = vld [vmem:[%s7461_s3 + $0x2a8] ss:$16 sps:$4 sm:$0xff]  }
 0x133   :  { %2774 = vmatpush1.bf16.msra.mxu0 %v5344_v62  ;;  %2856 = vmatpush1.bf16.msra.mxu1 %v5347_v63  ;;  %v5406_v62 = vld [vmem:[%s7461_s3 + $0x2c4] ss:$16 sps:$4 sm:$0xff]   ;;  %v5409_v63 = vld [vmem:[%s7461_s3 + $0x2cc] ss:$16 sps:$4 sm:$0xff]  }
 0x134   :  { %2775 = vmatprep.subr.bf16.mxu0 %v5352_v0  ;;  %2857 = vmatprep.subr.bf16.mxu1 %v5355_v1  ;;  %v5404_v0 = vld [vmem:[%s7461_s3 + $0x2c0] ss:$16 sps:$4 sm:$0xff]   ;;  %v5407_v1 = vld [vmem:[%s7461_s3 + $0x2c8] ss:$16 sps:$4 sm:$0xff]  }
 0x137   :  { %2776 = vmatpush1.bf16.msra.mxu0 %v5350_v2  ;;  %2858 = vmatpush1.bf16.msra.mxu1 %v5353_v3  ;;  %v5412_v2 = vld [vmem:[%s7461_s3 + $0x2e4] ss:$16 sps:$4 sm:$0xff]   ;;  %v5415_v3 = vld [vmem:[%s7461_s3 + $0x2ec] ss:$16 sps:$4 sm:$0xff]  }
 0x138   :  { %2777 = vmatprep.subr.bf16.mxu0 %v5358_v4  ;;  %2859 = vmatprep.subr.bf16.mxu1 %v5361_v5  ;;  %v5410_v4 = vld [vmem:[%s7461_s3 + $0x2e0] ss:$16 sps:$4 sm:$0xff]   ;;  %v5413_v5 = vld [vmem:[%s7461_s3 + $0x2e8] ss:$16 sps:$4 sm:$0xff]  }
 0x13b   :  { %2778 = vmatpush1.bf16.msra.mxu0 %v5356_v6  ;;  %2860 = vmatpush1.bf16.msra.mxu1 %v5359_v7  ;;  %v5418_v6 = vld [vmem:[%s7461_s3 + $0x304] ss:$16 sps:$4 sm:$0xff]   ;;  %v5421_v7 = vld [vmem:[%s7461_s3 + $0x30c] ss:$16 sps:$4 sm:$0xff]  }
 0x13c   :  { %2779 = vmatprep.subr.bf16.mxu0 %v5364_v8  ;;  %2861 = vmatprep.subr.bf16.mxu1 %v5367_v9  ;;  %v5416_v8 = vld [vmem:[%s7461_s3 + $0x300] ss:$16 sps:$4 sm:$0xff]   ;;  %v5419_v9 = vld [vmem:[%s7461_s3 + $0x308] ss:$16 sps:$4 sm:$0xff]  }
 0x13f   :  { %2780 = vmatpush1.bf16.msra.mxu0 %v5362_v10  ;;  %2862 = vmatpush1.bf16.msra.mxu1 %v5365_v12  ;;  %v5424_v10 = vld [vmem:[%s7461_s3 + $0x324] ss:$16 sps:$4 sm:$0xff]   ;;  %v5427_v12 = vld [vmem:[%s7461_s3 + $0x32c] ss:$16 sps:$4 sm:$0xff]  }
 0x140   :  { %2790 = vmatprep.subr.bf16.mxu0 %v5370_v13  ;;  %2872 = vmatprep.subr.bf16.mxu1 %v5373_v15  ;;  %v5422_v13 = vld [vmem:[%s7461_s3 + $0x320] ss:$16 sps:$4 sm:$0xff]   ;;  %v5425_v15 = vld [vmem:[%s7461_s3 + $0x328] ss:$16 sps:$4 sm:$0xff]  }
 0x1d5   :  { %v1780_v23 = vpop.f32.mrb[0].mxu0  ;;  %v6756_v24 = vpop.f32.mrb[0].mxu1 }
 0x1d6   :  { %v4828_v25 = vadd.f32 %v1780_v23, %v298_v20  ;;  %v1782_v26 = vpop.f32.mrb[1].mxu0  ;;  %v1946_v27 = vpop.f32.mrb[1].mxu1  ;;  %v5433_v20 = vld [vmem:[%s7461_s3 + $0x34c] ss:$16 sps:$4 sm:$0xff]   ;;  %v5436_v23 = vld [vmem:[%s7461_s3 + $0x364] ss:$16 sps:$4 sm:$0xff]  }
 0x1d7   :  { %v4829_v28 = vadd.f32 %v1782_v26, %v302_v21  ;;  %v4831_v29 = vadd.f32 %v1946_v27, %v310_v22  ;;  %v1784_v30 = vpop.f32.mrb[2].mxu0  ;;  %v1948_v31 = vpop.f32.mrb[2].mxu1  ;;  %v5428_v21 = vld [vmem:[%s7461_s3 + $0x340] ss:$16 sps:$4 sm:$0xff]   ;;  %v5431_v22 = vld [vmem:[%s7461_s3 + $0x348] ss:$16 sps:$4 sm:$0xff]  }
 0x1d8   :  { %v1951_v32 = vmax.f32 %v4828_v25, 0.0  ;;  %v1785_v33 = vpop.f32.mrb[3].mxu0  ;;  %v1949_v34 = vpop.f32.mrb[3].mxu1  ;;  %v5439_v25 = vld [vmem:[%s7461_s3 + $0x36c] ss:$16 sps:$4 sm:$0xff]  }
 0x1d9   :  { %v1952_v35 = vmax.f32 %v4829_v28, 0.0  ;;  %v1954_v38 = vmax.f32 %v4831_v29, 0.0  ;;  %v5434_v26 = vld [vmem:[%s7461_s3 + $0x360] ss:$16 sps:$4 sm:$0xff]   ;;  %v5437_v27 = vld [vmem:[%s7461_s3 + $0x368] ss:$16 sps:$4 sm:$0xff]  }
 0x1da   :  { %v1955_v40 = vpack.c.bf16 %v1951_v32, %v1951_v32  ;;  %v5442_v28 = vld [vmem:[%s7461_s3 + $0x384] ss:$16 sps:$4 sm:$0xff]   ;;  %v5445_v29 = vld [vmem:[%s7461_s3 + $0x38c] ss:$16 sps:$4 sm:$0xff]   ;;  %v5440_v30 = vld [vmem:[%s7461_s3 + $0x380] ss:$16 sps:$4 sm:$0xff]  }
 0x1db   :  { %v1956_v39 = vpack.c.bf16 %v1952_v35, %v1952_v35  ;;  %v1958_v43 = vpack.c.bf16 %v1954_v38, %v1954_v38  ;;  %v5443_v31 = vld [vmem:[%s7461_s3 + $0x388] ss:$16 sps:$4 sm:$0xff]   ;;  %v6909_v32 = vsub.s32 2, %v6734_v16  ;;  %v5448_v33 = vld [vmem:[%s7461_s3 + $0x3a4] ss:$16 sps:$4 sm:$0xff]  }
 0x1dc   :  { %v5451_v34 = vld [vmem:[%s7461_s3 + $0x3ac] ss:$16 sps:$4 sm:$0xff]   ;;  %v5446_v35 = vld [vmem:[%s7461_s3 + $0x3a0] ss:$16 sps:$4 sm:$0xff]   ;;  %v5449_v16 = vld [vmem:[%s7461_s3 + $0x3a8] ss:$16 sps:$4 sm:$0xff]  }
 0x1dd   :  { %2781 = vmatprep.mubr.bf16.mxu0 %v1956_v39  ;;  %2863 = vmatprep.mubr.bf16.mxu1 %v1956_v39  ;;  %v5457_v38 = vld [vmem:[%s7461_s3 + $0x3cc] ss:$16 sps:$4 sm:$0xff]   ;;  %v5452_v39 = vld [vmem:[%s7461_s3 + $0x3c0] ss:$16 sps:$4 sm:$0xff]  }
 0x1de   :  { %2782 = vmatmul.mubr.bf16.vlgmr.msra.gmra.mrb[4].mxu0 %v1955_v40  ;;  %2864 = vmatmul.mubr.bf16.vlgmr.msra.gmra.mrb[4].mxu1 %v1955_v40 }
 0x1df   :  { %2791 = vmatpush1.bf16.msra.mxu0 %v5368_v36  ;;  %2873 = vmatpush1.bf16.msra.mxu1 %v5371_v37  ;;  %v306_v36 = vrot.slane %v6742_v14, %v6909_v32  ;;  %v5454_v37 = vld [vmem:[%s7461_s3 + $0x3c4] ss:$16 sps:$4 sm:$0xff]   ;;  %v5455_v14 = vld [vmem:[%s7461_s3 + $0x3c8] ss:$16 sps:$4 sm:$0xff]  }
 0x1e0   :  { %2822 = vmatprep.mubr.bf16.mxu0 %v1958_v43  ;;  %2904 = vmatprep.mubr.bf16.mxu1 %v1958_v43  ;;  %v5458_v43 = vld [vmem:[%s7461_s3 + $0x3e0] ss:$16 sps:$4 sm:$0xff]  }
 0x1e1   :  { %2792 = vmatprep.subr.bf16.mxu0 %v5376_v41  ;;  %2874 = vmatprep.subr.bf16.mxu1 %v5379_v42  ;;  %v4830_v40 = vadd.f32 %v6756_v24, %v306_v36  ;;  %v5460_v41 = vld [vmem:[%s7461_s3 + $0x3e4] ss:$16 sps:$4 sm:$0xff]   ;;  %v5463_v42 = vld [vmem:[%s7461_s3 + $0x3ec] ss:$16 sps:$4 sm:$0xff]   ;;  %v5461_v24 = vld [vmem:[%s7461_s3 + $0x3e8] ss:$16 sps:$4 sm:$0xff]  }
 0x1e2   :  { %v5538_v36 = vld [vmem:[%s7462_s5 + $0x184] ss:$16 sps:$4 sm:$0xff]  }
 0x1e3   :  { %2793 = vmatpush1.bf16.msra.mxu0 %v5374_v44  ;;  %2875 = vmatpush1.bf16.msra.mxu1 %v5377_v45  ;;  %v1953_v44 = vmax.f32 %v4830_v40, 0.0  ;;  %v5466_v45 = vld [vmem:[%s7462_s5 + $0x4] ss:$16 sps:$4 sm:$0xff]   ;;  %v5547_v40 = vld [vmem:[%s7462_s5 + $0x1ac] ss:$16 sps:$4 sm:$0xff]  }
 0x1e4   :  { %2794 = vmatprep.subr.bf16.mxu0 %v5382_v46  ;;  %2876 = vmatprep.subr.bf16.mxu1 %v5385_v47  ;;  %v5469_v46 = vld [vmem:[%s7462_s5 + $0xc] ss:$16 sps:$4 sm:$0xff]   ;;  %v5464_v47 = vld [vmem:[%s7462_s5] ss:$16 sps:$4 sm:$0xff]  }
 0x1e7   :  { %2795 = vmatpush1.bf16.msra.mxu0 %v5380_v48  ;;  %2877 = vmatpush1.bf16.msra.mxu1 %v5383_v49  ;;  %v5467_v48 = vld [vmem:[%s7462_s5 + $0x8] ss:$16 sps:$4 sm:$0xff]   ;;  %v1957_v49 = vpack.c.bf16 %v1953_v44, %v1953_v44  ;;  %v5548_v44 = vld [vmem:[%s7462_s5 + $0x1c0] ss:$16 sps:$4 sm:$0xff]  }
 0x1e8   :  { %2796 = vmatprep.subr.bf16.mxu0 %v5388_v50  ;;  %2878 = vmatprep.subr.bf16.mxu1 %v5391_v51  ;;  %v5472_v50 = vld [vmem:[%s7462_s5 + $0x24] ss:$16 sps:$4 sm:$0xff]   ;;  %v5475_v51 = vld [vmem:[%s7462_s5 + $0x2c] ss:$16 sps:$4 sm:$0xff]  }
 0x1eb   :  { %2797 = vmatpush1.bf16.msra.mxu0 %v5386_v52  ;;  %2879 = vmatpush1.bf16.msra.mxu1 %v5389_v53  ;;  %v5470_v52 = vld [vmem:[%s7462_s5 + $0x20] ss:$16 sps:$4 sm:$0xff]   ;;  %v5473_v53 = vld [vmem:[%s7462_s5 + $0x28] ss:$16 sps:$4 sm:$0xff]  }
 0x1ec   :  { %2798 = vmatprep.subr.bf16.mxu0 %v5394_v54  ;;  %2880 = vmatprep.subr.bf16.mxu1 %v5397_v55  ;;  %v5478_v54 = vld [vmem:[%s7462_s5 + $0x44] ss:$16 sps:$4 sm:$0xff]   ;;  %v5481_v55 = vld [vmem:[%s7462_s5 + $0x4c] ss:$16 sps:$4 sm:$0xff]  }
 0x1ef   :  { %2799 = vmatpush1.bf16.msra.mxu0 %v5392_v56  ;;  %2881 = vmatpush1.bf16.msra.mxu1 %v5395_v57  ;;  %v5476_v56 = vld [vmem:[%s7462_s5 + $0x40] ss:$16 sps:$4 sm:$0xff]   ;;  %v5479_v57 = vld [vmem:[%s7462_s5 + $0x48] ss:$16 sps:$4 sm:$0xff]  }
 0x1f0   :  { %2800 = vmatprep.subr.bf16.mxu0 %v5400_v58  ;;  %2882 = vmatprep.subr.bf16.mxu1 %v5403_v59  ;;  %v5484_v58 = vld [vmem:[%s7462_s5 + $0x64] ss:$16 sps:$4 sm:$0xff]   ;;  %v5487_v59 = vld [vmem:[%s7462_s5 + $0x6c] ss:$16 sps:$4 sm:$0xff]  }
 0x1f3   :  { %2801 = vmatpush1.bf16.msra.mxu0 %v5398_v60  ;;  %2883 = vmatpush1.bf16.msra.mxu1 %v5401_v61  ;;  %v5482_v60 = vld [vmem:[%s7462_s5 + $0x60] ss:$16 sps:$4 sm:$0xff]   ;;  %v5485_v61 = vld [vmem:[%s7462_s5 + $0x68] ss:$16 sps:$4 sm:$0xff]  }
 0x1f4   :  { %2802 = vmatprep.subr.bf16.mxu0 %v5406_v62  ;;  %2884 = vmatprep.subr.bf16.mxu1 %v5409_v63  ;;  %v5490_v62 = vld [vmem:[%s7462_s5 + $0x84] ss:$16 sps:$4 sm:$0xff]   ;;  %v5493_v63 = vld [vmem:[%s7462_s5 + $0x8c] ss:$16 sps:$4 sm:$0xff]  }
 0x1f7   :  { %2803 = vmatpush1.bf16.msra.mxu0 %v5404_v0  ;;  %2885 = vmatpush1.bf16.msra.mxu1 %v5407_v1  ;;  %v5488_v0 = vld [vmem:[%s7462_s5 + $0x80] ss:$16 sps:$4 sm:$0xff]   ;;  %v5491_v1 = vld [vmem:[%s7462_s5 + $0x88] ss:$16 sps:$4 sm:$0xff]  }
 0x1f8   :  { %2804 = vmatprep.subr.bf16.mxu0 %v5412_v2  ;;  %2886 = vmatprep.subr.bf16.mxu1 %v5415_v3  ;;  %v5496_v2 = vld [vmem:[%s7462_s5 + $0xa4] ss:$16 sps:$4 sm:$0xff]   ;;  %v5499_v3 = vld [vmem:[%s7462_s5 + $0xac] ss:$16 sps:$4 sm:$0xff]  }
 0x1fb   :  { %2805 = vmatpush1.bf16.msra.mxu0 %v5410_v4  ;;  %2887 = vmatpush1.bf16.msra.mxu1 %v5413_v5  ;;  %v5494_v4 = vld [vmem:[%s7462_s5 + $0xa0] ss:$16 sps:$4 sm:$0xff]   ;;  %v5497_v5 = vld [vmem:[%s7462_s5 + $0xa8] ss:$16 sps:$4 sm:$0xff]  }
 0x1fc   :  { %2806 = vmatprep.subr.bf16.mxu0 %v5418_v6  ;;  %2888 = vmatprep.subr.bf16.mxu1 %v5421_v7  ;;  %v5502_v6 = vld [vmem:[%s7462_s5 + $0xc4] ss:$16 sps:$4 sm:$0xff]   ;;  %v5505_v7 = vld [vmem:[%s7462_s5 + $0xcc] ss:$16 sps:$4 sm:$0xff]  }
 0x1ff   :  { %2807 = vmatpush1.bf16.msra.mxu0 %v5416_v8  ;;  %2889 = vmatpush1.bf16.msra.mxu1 %v5419_v9  ;;  %v5500_v8 = vld [vmem:[%s7462_s5 + $0xc0] ss:$16 sps:$4 sm:$0xff]   ;;  %v5503_v9 = vld [vmem:[%s7462_s5 + $0xc8] ss:$16 sps:$4 sm:$0xff]  }
 0x200   :  { %2808 = vmatprep.subr.bf16.mxu0 %v5424_v10  ;;  %2890 = vmatprep.subr.bf16.mxu1 %v5427_v12  ;;  %v5508_v10 = vld [vmem:[%s7462_s5 + $0xe4] ss:$16 sps:$4 sm:$0xff]   ;;  %v5511_v12 = vld [vmem:[%s7462_s5 + $0xec] ss:$16 sps:$4 sm:$0xff]  }
 0x203   :  { %2809 = vmatpush1.bf16.msra.mxu0 %v5422_v13  ;;  %2891 = vmatpush1.bf16.msra.mxu1 %v5425_v15  ;;  %v5506_v13 = vld [vmem:[%s7462_s5 + $0xe0] ss:$16 sps:$4 sm:$0xff]   ;;  %v5509_v15 = vld [vmem:[%s7462_s5 + $0xe8] ss:$16 sps:$4 sm:$0xff]  }
 0x204   :  { %2810 = vmatprep.subr.bf16.mxu0 %v5430_v11  ;;  %2892 = vmatprep.subr.bf16.mxu1 %v5433_v20  ;;  %v5514_v11 = vld [vmem:[%s7462_s5 + $0x104] ss:$16 sps:$4 sm:$0xff]   ;;  %v5517_v20 = vld [vmem:[%s7462_s5 + $0x10c] ss:$16 sps:$4 sm:$0xff]  }
 0x207   :  { %2811 = vmatpush1.bf16.msra.mxu0 %v5428_v21  ;;  %2893 = vmatpush1.bf16.msra.mxu1 %v5431_v22  ;;  %v5512_v21 = vld [vmem:[%s7462_s5 + $0x100] ss:$16 sps:$4 sm:$0xff]   ;;  %v5515_v22 = vld [vmem:[%s7462_s5 + $0x108] ss:$16 sps:$4 sm:$0xff]  }
 0x208   :  { %2812 = vmatprep.subr.bf16.mxu0 %v5436_v23  ;;  %2894 = vmatprep.subr.bf16.mxu1 %v5439_v25  ;;  %v5520_v23 = vld [vmem:[%s7462_s5 + $0x124] ss:$16 sps:$4 sm:$0xff]   ;;  %v5523_v25 = vld [vmem:[%s7462_s5 + $0x12c] ss:$16 sps:$4 sm:$0xff]  }
 0x20b   :  { %2813 = vmatpush1.bf16.msra.mxu0 %v5434_v26  ;;  %2895 = vmatpush1.bf16.msra.mxu1 %v5437_v27  ;;  %v5518_v26 = vld [vmem:[%s7462_s5 + $0x120] ss:$16 sps:$4 sm:$0xff]   ;;  %v5521_v27 = vld [vmem:[%s7462_s5 + $0x128] ss:$16 sps:$4 sm:$0xff]  }
 0x20c   :  { %2814 = vmatprep.subr.bf16.mxu0 %v5442_v28  ;;  %2896 = vmatprep.subr.bf16.mxu1 %v5445_v29  ;;  %v5526_v28 = vld [vmem:[%s7462_s5 + $0x144] ss:$16 sps:$4 sm:$0xff]   ;;  %v5529_v29 = vld [vmem:[%s7462_s5 + $0x14c] ss:$16 sps:$4 sm:$0xff]  }
 0x20f   :  { %2815 = vmatpush1.bf16.msra.mxu0 %v5440_v30  ;;  %2897 = vmatpush1.bf16.msra.mxu1 %v5443_v31  ;;  %v5524_v30 = vld [vmem:[%s7462_s5 + $0x140] ss:$16 sps:$4 sm:$0xff]   ;;  %v5527_v31 = vld [vmem:[%s7462_s5 + $0x148] ss:$16 sps:$4 sm:$0xff]  }
 0x210   :  { %2816 = vmatprep.subr.bf16.mxu0 %v5448_v33  ;;  %2898 = vmatprep.subr.bf16.mxu1 %v5451_v34  ;;  %v5532_v33 = vld [vmem:[%s7462_s5 + $0x164] ss:$16 sps:$4 sm:$0xff]   ;;  %v5535_v34 = vld [vmem:[%s7462_s5 + $0x16c] ss:$16 sps:$4 sm:$0xff]  }
 0x213   :  { %2817 = vmatpush1.bf16.msra.mxu0 %v5446_v35  ;;  %2899 = vmatpush1.bf16.msra.mxu1 %v5449_v16  ;;  %v5530_v35 = vld [vmem:[%s7462_s5 + $0x160] ss:$16 sps:$4 sm:$0xff]   ;;  %v5533_v16 = vld [vmem:[%s7462_s5 + $0x168] ss:$16 sps:$4 sm:$0xff]  }
 0x214   :  { %2818 = vmatprep.subr.bf16.mxu0 %v5454_v37  ;;  %2900 = vmatprep.subr.bf16.mxu1 %v5457_v38  ;;  %v5541_v37 = vld [vmem:[%s7462_s5 + $0x18c] ss:$16 sps:$4 sm:$0xff]   ;;  %v5536_v38 = vld [vmem:[%s7462_s5 + $0x180] ss:$16 sps:$4 sm:$0xff]  }
 0x217   :  { %2819 = vmatpush1.bf16.msra.mxu0 %v5452_v39  ;;  %2901 = vmatpush1.bf16.msra.mxu1 %v5455_v14  ;;  %v5539_v39 = vld [vmem:[%s7462_s5 + $0x188] ss:$16 sps:$4 sm:$0xff]   ;;  %v5544_v14 = vld [vmem:[%s7462_s5 + $0x1a4] ss:$16 sps:$4 sm:$0xff]  }
 0x218   :  { %2820 = vmatprep.subr.bf16.mxu0 %v5460_v41  ;;  %2902 = vmatprep.subr.bf16.mxu1 %v5463_v42  ;;  %v5542_v41 = vld [vmem:[%s7462_s5 + $0x1a0] ss:$16 sps:$4 sm:$0xff]   ;;  %v5545_v42 = vld [vmem:[%s7462_s5 + $0x1a8] ss:$16 sps:$4 sm:$0xff]  }
 0x21b   :  { %2821 = vmatpush1.bf16.msra.mxu0 %v5458_v43  ;;  %2903 = vmatpush1.bf16.msra.mxu1 %v5461_v24  ;;  %v5550_v43 = vld [vmem:[%s7462_s5 + $0x1c4] ss:$16 sps:$4 sm:$0xff]   ;;  %v5553_v24 = vld [vmem:[%s7462_s5 + $0x1cc] ss:$16 sps:$4 sm:$0xff]  }
 0x21c   :  { %3711 = vmatprep.subr.bf16.mxu0 %v5466_v45  ;;  %3793 = vmatprep.subr.bf16.mxu1 %v5469_v46  ;;  %v5551_v45 = vld [vmem:[%s7462_s5 + $0x1c8] ss:$16 sps:$4 sm:$0xff]   ;;  %v5556_v46 = vld [vmem:[%s7462_s5 + $0x1e4] ss:$16 sps:$4 sm:$0xff]  }
 0x21e   :  { %2823 = vmatmul.mubr.bf16.vlgmr.msra.gmra.mrb[4].mxu0 %v1957_v49  ;;  %2905 = vmatmul.mubr.bf16.vlgmr.msra.gmra.mrb[4].mxu1 %v1957_v49  ;;  %v5557_v49 = vld [vmem:[%s7462_s5 + $0x1e8] ss:$16 sps:$4 sm:$0xff]  }
 0x21f   :  { %3712 = vmatpush1.bf16.msra.mxu0 %v5464_v47  ;;  %3794 = vmatpush1.bf16.msra.mxu1 %v5467_v48  ;;  %v5559_v47 = vld [vmem:[%s7462_s5 + $0x1ec] ss:$16 sps:$4 sm:$0xff]   ;;  %v5554_v48 = vld [vmem:[%s7462_s5 + $0x1e0] ss:$16 sps:$4 sm:$0xff]  }
 0x220   :  { %3713 = vmatprep.subr.bf16.mxu0 %v5472_v50  ;;  %3795 = vmatprep.subr.bf16.mxu1 %v5475_v51  ;;  %v5562_v50 = vld [vmem:[%s7462_s5 + $0x204] ss:$16 sps:$4 sm:$0xff]   ;;  %v5565_v51 = vld [vmem:[%s7462_s5 + $0x20c] ss:$16 sps:$4 sm:$0xff]  }
 0x223   :  { %3714 = vmatpush1.bf16.msra.mxu0 %v5470_v52  ;;  %3796 = vmatpush1.bf16.msra.mxu1 %v5473_v53  ;;  %v7151_v52 = vld [vmem:[%s7465_s4] sm:$0xf] }
 0x224   :  { %3715 = vmatprep.subr.bf16.mxu0 %v5478_v54  ;;  %3797 = vmatprep.subr.bf16.mxu1 %v5481_v55  ;;  %v2092_v53 = vrot.slane %v7151_v52, %v6737_v17  ;;  %v2096_v54 = vrot.slane %v7151_v52, %v6745_v18  ;;  %v2104_v55 = vrot.slane %v7151_v52, %v6748_v19 }
 0x227   :  { %3716 = vmatpush1.bf16.msra.mxu0 %v5476_v56  ;;  %3798 = vmatpush1.bf16.msra.mxu1 %v5479_v57 }
 0x228   :  { %3717 = vmatprep.subr.bf16.mxu0 %v5484_v58  ;;  %3799 = vmatprep.subr.bf16.mxu1 %v5487_v59 }
 0x22b   :  { %3718 = vmatpush1.bf16.msra.mxu0 %v5482_v60  ;;  %3800 = vmatpush1.bf16.msra.mxu1 %v5485_v61 }
 0x22c   :  { %3719 = vmatprep.subr.bf16.mxu0 %v5490_v62  ;;  %3801 = vmatprep.subr.bf16.mxu1 %v5493_v63 }
 0x22f   :  { %3720 = vmatpush1.bf16.msra.mxu0 %v5488_v0  ;;  %3802 = vmatpush1.bf16.msra.mxu1 %v5491_v1 }
 0x230   :  { %3721 = vmatprep.subr.bf16.mxu0 %v5496_v2  ;;  %3803 = vmatprep.subr.bf16.mxu1 %v5499_v3 }
 0x233   :  { %3722 = vmatpush1.bf16.msra.mxu0 %v5494_v4  ;;  %3804 = vmatpush1.bf16.msra.mxu1 %v5497_v5 }
 0x234   :  { %3723 = vmatprep.subr.bf16.mxu0 %v5502_v6  ;;  %3805 = vmatprep.subr.bf16.mxu1 %v5505_v7  ;;  %v5560_v7 = vld [vmem:[%s7462_s5 + $0x200] ss:$16 sps:$4 sm:$0xff]  }
 0x237   :  { %3724 = vmatpush1.bf16.msra.mxu0 %v5500_v8  ;;  %3806 = vmatpush1.bf16.msra.mxu1 %v5503_v9  ;;  %v5563_v8 = vld [vmem:[%s7462_s5 + $0x208] ss:$16 sps:$4 sm:$0xff]  }
 0x238   :  { %3725 = vmatprep.subr.bf16.mxu0 %v5508_v10  ;;  %3807 = vmatprep.subr.bf16.mxu1 %v5511_v12  ;;  %v5568_v10 = vld [vmem:[%s7462_s5 + $0x224] ss:$16 sps:$4 sm:$0xff]   ;;  %v5571_v12 = vld [vmem:[%s7462_s5 + $0x22c] ss:$16 sps:$4 sm:$0xff]  }
 0x23b   :  { %3726 = vmatpush1.bf16.msra.mxu0 %v5506_v13  ;;  %3808 = vmatpush1.bf16.msra.mxu1 %v5509_v15  ;;  %v5566_v15 = vld [vmem:[%s7462_s5 + $0x220] ss:$16 sps:$4 sm:$0xff]  }
 0x23c   :  { %3727 = vmatprep.subr.bf16.mxu0 %v5514_v11  ;;  %3809 = vmatprep.subr.bf16.mxu1 %v5517_v20  ;;  %v5569_v11 = vld [vmem:[%s7462_s5 + $0x228] ss:$16 sps:$4 sm:$0xff]   ;;  %v5574_v20 = vld [vmem:[%s7462_s5 + $0x244] ss:$16 sps:$4 sm:$0xff]  }
 0x23f   :  { %3728 = vmatpush1.bf16.msra.mxu0 %v5512_v21  ;;  %3810 = vmatpush1.bf16.msra.mxu1 %v5515_v22  ;;  %v5577_v21 = vld [vmem:[%s7462_s5 + $0x24c] ss:$16 sps:$4 sm:$0xff]   ;;  %v5572_v22 = vld [vmem:[%s7462_s5 + $0x240] ss:$16 sps:$4 sm:$0xff]  }
 0x240   :  { %3729 = vmatprep.subr.bf16.mxu0 %v5520_v23  ;;  %3811 = vmatprep.subr.bf16.mxu1 %v5523_v25  ;;  %v5575_v23 = vld [vmem:[%s7462_s5 + $0x248] ss:$16 sps:$4 sm:$0xff]   ;;  %v5580_v25 = vld [vmem:[%s7462_s5 + $0x264] ss:$16 sps:$4 sm:$0xff]  }
 0x243   :  { %3730 = vmatpush1.bf16.msra.mxu0 %v5518_v26  ;;  %3812 = vmatpush1.bf16.msra.mxu1 %v5521_v27  ;;  %v5583_v26 = vld [vmem:[%s7462_s5 + $0x26c] ss:$16 sps:$4 sm:$0xff]   ;;  %v5578_v27 = vld [vmem:[%s7462_s5 + $0x260] ss:$16 sps:$4 sm:$0xff]  }
 0x244   :  { %3731 = vmatprep.subr.bf16.mxu0 %v5526_v28  ;;  %3813 = vmatprep.subr.bf16.mxu1 %v5529_v29  ;;  %v5581_v28 = vld [vmem:[%s7462_s5 + $0x268] ss:$16 sps:$4 sm:$0xff]   ;;  %v5586_v29 = vld [vmem:[%s7462_s5 + $0x284] ss:$16 sps:$4 sm:$0xff]  }
 0x247   :  { %3732 = vmatpush1.bf16.msra.mxu0 %v5524_v30  ;;  %3814 = vmatpush1.bf16.msra.mxu1 %v5527_v31  ;;  %v5589_v30 = vld [vmem:[%s7462_s5 + $0x28c] ss:$16 sps:$4 sm:$0xff]   ;;  %v5584_v31 = vld [vmem:[%s7462_s5 + $0x280] ss:$16 sps:$4 sm:$0xff]  }
 0x248   :  { %3733 = vmatprep.subr.bf16.mxu0 %v5532_v33  ;;  %3815 = vmatprep.subr.bf16.mxu1 %v5535_v34  ;;  %v5587_v33 = vld [vmem:[%s7462_s5 + $0x288] ss:$16 sps:$4 sm:$0xff]   ;;  %v5592_v34 = vld [vmem:[%s7462_s5 + $0x2a4] ss:$16 sps:$4 sm:$0xff]  }
 0x24b   :  { %3734 = vmatpush1.bf16.msra.mxu0 %v5530_v35  ;;  %3816 = vmatpush1.bf16.msra.mxu1 %v5533_v16  ;;  %v5595_v35 = vld [vmem:[%s7462_s5 + $0x2ac] ss:$16 sps:$4 sm:$0xff]   ;;  %v5590_v16 = vld [vmem:[%s7462_s5 + $0x2a0] ss:$16 sps:$4 sm:$0xff]  }
 0x24c   :  { %3735 = vmatprep.subr.bf16.mxu0 %v5538_v36  ;;  %3817 = vmatprep.subr.bf16.mxu1 %v5541_v37  ;;  %v5593_v36 = vld [vmem:[%s7462_s5 + $0x2a8] ss:$16 sps:$4 sm:$0xff]   ;;  %v5598_v37 = vld [vmem:[%s7462_s5 + $0x2c4] ss:$16 sps:$4 sm:$0xff]  }
 0x24f   :  { %3736 = vmatpush1.bf16.msra.mxu0 %v5536_v38  ;;  %3818 = vmatpush1.bf16.msra.mxu1 %v5539_v39  ;;  %v5601_v38 = vld [vmem:[%s7462_s5 + $0x2cc] ss:$16 sps:$4 sm:$0xff]   ;;  %v5596_v39 = vld [vmem:[%s7462_s5 + $0x2c0] ss:$16 sps:$4 sm:$0xff]  }
 0x250   :  { %3737 = vmatprep.subr.bf16.mxu0 %v5544_v14  ;;  %3819 = vmatprep.subr.bf16.mxu1 %v5547_v40  ;;  %v5599_v14 = vld [vmem:[%s7462_s5 + $0x2c8] ss:$16 sps:$4 sm:$0xff]   ;;  %v5604_v40 = vld [vmem:[%s7462_s5 + $0x2e4] ss:$16 sps:$4 sm:$0xff]  }
 0x253   :  { %3738 = vmatpush1.bf16.msra.mxu0 %v5542_v41  ;;  %3820 = vmatpush1.bf16.msra.mxu1 %v5545_v42  ;;  %v5607_v41 = vld [vmem:[%s7462_s5 + $0x2ec] ss:$16 sps:$4 sm:$0xff]   ;;  %v5602_v42 = vld [vmem:[%s7462_s5 + $0x2e0] ss:$16 sps:$4 sm:$0xff]  }
 0x254   :  { %3739 = vmatprep.subr.bf16.mxu0 %v5550_v43  ;;  %3821 = vmatprep.subr.bf16.mxu1 %v5553_v24  ;;  %v5605_v43 = vld [vmem:[%s7462_s5 + $0x2e8] ss:$16 sps:$4 sm:$0xff]   ;;  %v5610_v24 = vld [vmem:[%s7462_s5 + $0x304] ss:$16 sps:$4 sm:$0xff]  }
 0x257   :  { %3740 = vmatpush1.bf16.msra.mxu0 %v5548_v44  ;;  %3822 = vmatpush1.bf16.msra.mxu1 %v5551_v45  ;;  %v5613_v44 = vld [vmem:[%s7462_s5 + $0x30c] ss:$16 sps:$4 sm:$0xff]   ;;  %v5608_v45 = vld [vmem:[%s7462_s5 + $0x300] ss:$16 sps:$4 sm:$0xff]  }
 0x258   :  { %3741 = vmatprep.subr.bf16.mxu0 %v5556_v46  ;;  %3823 = vmatprep.subr.bf16.mxu1 %v5559_v47  ;;  %v5611_v46 = vld [vmem:[%s7462_s5 + $0x308] ss:$16 sps:$4 sm:$0xff]   ;;  %v5616_v47 = vld [vmem:[%s7462_s5 + $0x324] ss:$16 sps:$4 sm:$0xff]  }
 0x25b   :  { %3742 = vmatpush1.bf16.msra.mxu0 %v5554_v48  ;;  %3824 = vmatpush1.bf16.msra.mxu1 %v5557_v49  ;;  %v5619_v48 = vld [vmem:[%s7462_s5 + $0x32c] ss:$16 sps:$4 sm:$0xff]   ;;  %v5614_v49 = vld [vmem:[%s7462_s5 + $0x320] ss:$16 sps:$4 sm:$0xff]  }
 0x25c   :  { %3752 = vmatprep.subr.bf16.mxu0 %v5562_v50  ;;  %3834 = vmatprep.subr.bf16.mxu1 %v5565_v51  ;;  %v5617_v50 = vld [vmem:[%s7462_s5 + $0x328] ss:$16 sps:$4 sm:$0xff]   ;;  %v5622_v51 = vld [vmem:[%s7462_s5 + $0x344] ss:$16 sps:$4 sm:$0xff]  }
 0x2f1   :  { %v2824_v56 = vpop.f32.mrb[4].mxu0  ;;  %v7159_v57 = vpop.f32.mrb[4].mxu1 }
 0x2f2   :  { %v4832_v58 = vadd.f32 %v2824_v56, %v2092_v53  ;;  %v2826_v59 = vpop.f32.mrb[5].mxu0  ;;  %v2908_v60 = vpop.f32.mrb[5].mxu1  ;;  %v5625_v53 = vld [vmem:[%s7462_s5 + $0x34c] ss:$16 sps:$4 sm:$0xff]   ;;  %v5628_v56 = vld [vmem:[%s7462_s5 + $0x364] ss:$16 sps:$4 sm:$0xff]  }
 0x2f3   :  { %v4833_v61 = vadd.f32 %v2826_v59, %v2096_v54  ;;  %v4835_v62 = vadd.f32 %v2908_v60, %v2104_v55  ;;  %v2828_v63 = vpop.f32.mrb[6].mxu0  ;;  %v2910_v0 = vpop.f32.mrb[6].mxu1  ;;  %v5620_v54 = vld [vmem:[%s7462_s5 + $0x340] ss:$16 sps:$4 sm:$0xff]   ;;  %v5623_v55 = vld [vmem:[%s7462_s5 + $0x348] ss:$16 sps:$4 sm:$0xff]  }
 0x2f4   :  { %v2913_v1 = vmax.f32 %v4832_v58, 0.0  ;;  %v2829_v2 = vpop.f32.mrb[7].mxu0  ;;  %v2911_v3 = vpop.f32.mrb[7].mxu1  ;;  %v5631_v58 = vld [vmem:[%s7462_s5 + $0x36c] ss:$16 sps:$4 sm:$0xff]  }
 0x2f5   :  { %v2914_v4 = vmax.f32 %v4833_v61, 0.0  ;;  %v2916_v5 = vmax.f32 %v4835_v62, 0.0  ;;  %v5626_v59 = vld [vmem:[%s7462_s5 + $0x360] ss:$16 sps:$4 sm:$0xff]   ;;  %v5629_v60 = vld [vmem:[%s7462_s5 + $0x368] ss:$16 sps:$4 sm:$0xff]  }
 0x2f6   :  { %v2917_v9 = vpack.c.bf16 %v2913_v1, %v2913_v1  ;;  %v5634_v61 = vld [vmem:[%s7462_s5 + $0x384] ss:$16 sps:$4 sm:$0xff]   ;;  %v5637_v62 = vld [vmem:[%s7462_s5 + $0x38c] ss:$16 sps:$4 sm:$0xff]   ;;  %v5632_v63 = vld [vmem:[%s7462_s5 + $0x380] ss:$16 sps:$4 sm:$0xff]  }
 0x2f7   :  { %v2918_v6 = vpack.c.bf16 %v2914_v4, %v2914_v4  ;;  %v2920_v13 = vpack.c.bf16 %v2916_v5, %v2916_v5  ;;  %v5635_v0 = vld [vmem:[%s7462_s5 + $0x388] ss:$16 sps:$4 sm:$0xff]   ;;  %v5640_v1 = vld [vmem:[%s7462_s5 + $0x3a4] ss:$16 sps:$4 sm:$0xff]   ;;  %v5643_v2 = vld [vmem:[%s7462_s5 + $0x3ac] ss:$16 sps:$4 sm:$0xff]   ;;  %v2100_v5 = vrot.slane %v7151_v52, %v6909_v32 }
 0x2f8   :  { %v5638_v3 = vld [vmem:[%s7462_s5 + $0x3a0] ss:$16 sps:$4 sm:$0xff]   ;;  %v5641_v4 = vld [vmem:[%s7462_s5 + $0x3a8] ss:$16 sps:$4 sm:$0xff]  }
 0x2f9   :  { %3743 = vmatprep.mubr.bf16.mxu0 %v2918_v6  ;;  %3825 = vmatprep.mubr.bf16.mxu1 %v2918_v6  ;;  %v5646_v6 = vld [vmem:[%s7462_s5 + $0x3c4] ss:$16 sps:$4 sm:$0xff]   ;;  %v5647_v52 = vld [vmem:[%s7462_s5 + $0x3c8] ss:$16 sps:$4 sm:$0xff]  }
 0x2fa   :  { %3744 = vmatmul.mubr.bf16.vlgmr.msra.gmra.mrb[8].mxu0 %v2917_v9  ;;  %3826 = vmatmul.mubr.bf16.vlgmr.msra.gmra.mrb[8].mxu1 %v2917_v9  ;;  %v4834_v9 = vadd.f32 %v7159_v57, %v2100_v5  ;;  %v5653_v57 = vld [vmem:[%s7462_s5 + $0x3e8] ss:$16 sps:$4 sm:$0xff]  }
 0x2fb   :  { %3753 = vmatpush1.bf16.msra.mxu0 %v5560_v7  ;;  %3835 = vmatpush1.bf16.msra.mxu1 %v5563_v8  ;;  %v5649_v7 = vld [vmem:[%s7462_s5 + $0x3cc] ss:$16 sps:$4 sm:$0xff]   ;;  %v5644_v8 = vld [vmem:[%s7462_s5 + $0x3c0] ss:$16 sps:$4 sm:$0xff]  }
 0x2fc   :  { %3784 = vmatprep.mubr.bf16.mxu0 %v2920_v13  ;;  %3866 = vmatprep.mubr.bf16.mxu1 %v2920_v13  ;;  %v5650_v13 = vld [vmem:[%s7462_s5 + $0x3e0] ss:$16 sps:$4 sm:$0xff]  }
 0x2fd   :  { %3754 = vmatprep.subr.bf16.mxu0 %v5568_v10  ;;  %3836 = vmatprep.subr.bf16.mxu1 %v5571_v12  ;;  %v5652_v10 = vld [vmem:[%s7462_s5 + $0x3e4] ss:$16 sps:$4 sm:$0xff]   ;;  %v5655_v12 = vld [vmem:[%s7462_s5 + $0x3ec] ss:$16 sps:$4 sm:$0xff]  }
 0x2ff   :  { %3755 = vmatpush1.bf16.msra.mxu0 %v5566_v15  ;;  %3837 = vmatpush1.bf16.msra.mxu1 %v5569_v11  ;;  %v2915_v15 = vmax.f32 %v4834_v9, 0.0  ;;  %v5656_v11 = vld [vmem:[%s7464_s7 + $0x40] sm:$0xff]  }
 0x300   :  { %3756 = vmatprep.subr.bf16.mxu0 %v5574_v20  ;;  %3838 = vmatprep.subr.bf16.mxu1 %v5577_v21  ;;  %v5657_v20 = vld [vmem:[%s7464_s7 + $0xc0] sm:$0xff]  }
 0x301   :  { %v5658_v21 = vld [vmem:[%s7464_s7] sm:$0xff]  }
 0x303   :  { %3757 = vmatpush1.bf16.msra.mxu0 %v5572_v22  ;;  %3839 = vmatpush1.bf16.msra.mxu1 %v5575_v23  ;;  %v5659_v22 = vld [vmem:[%s7464_s7 + $0x80] sm:$0xff]   ;;  %v2919_v23 = vpack.c.bf16 %v2915_v15, %v2915_v15 }
 0x304   :  { %3758 = vmatprep.subr.bf16.mxu0 %v5580_v25  ;;  %3840 = vmatprep.subr.bf16.mxu1 %v5583_v26  ;;  %v5660_v25 = vld [vmem:[%s7464_s7 + $0x48] sm:$0xff]  }
 0x305   :  { %v5661_v26 = vld [vmem:[%s7464_s7 + $0xc8] sm:$0xff]  }
 0x307   :  { %3759 = vmatpush1.bf16.msra.mxu0 %v5578_v27  ;;  %3841 = vmatpush1.bf16.msra.mxu1 %v5581_v28  ;;  %v5662_v27 = vld [vmem:[%s7464_s7 + $0x8] sm:$0xff]  }
 0x308   :  { %3760 = vmatprep.subr.bf16.mxu0 %v5586_v29  ;;  %3842 = vmatprep.subr.bf16.mxu1 %v5589_v30  ;;  %v5663_v28 = vld [vmem:[%s7464_s7 + $0x88] sm:$0xff]   ;;  %v5664_v29 = vld [vmem:[%s7464_s7 + $0x50] sm:$0xff]  }
 0x309   :  { %v5665_v30 = vld [vmem:[%s7464_s7 + $0xd0] sm:$0xff]  }
 0x30b   :  { %3761 = vmatpush1.bf16.msra.mxu0 %v5584_v31  ;;  %3843 = vmatpush1.bf16.msra.mxu1 %v5587_v33  ;;  %v5666_v31 = vld [vmem:[%s7464_s7 + $0x10] sm:$0xff]  }
 0x30c   :  { %3762 = vmatprep.subr.bf16.mxu0 %v5592_v34  ;;  %3844 = vmatprep.subr.bf16.mxu1 %v5595_v35  ;;  %v5667_v33 = vld [vmem:[%s7464_s7 + $0x90] sm:$0xff]   ;;  %v5668_v34 = vld [vmem:[%s7464_s7 + $0x58] sm:$0xff]  }
 0x30d   :  { %v5669_v35 = vld [vmem:[%s7464_s7 + $0xd8] sm:$0xff]  }
 0x30f   :  { %3763 = vmatpush1.bf16.msra.mxu0 %v5590_v16  ;;  %3845 = vmatpush1.bf16.msra.mxu1 %v5593_v36  ;;  %v5670_v16 = vld [vmem:[%s7464_s7 + $0x18] sm:$0xff]  }
 0x310   :  { %3764 = vmatprep.subr.bf16.mxu0 %v5598_v37  ;;  %3846 = vmatprep.subr.bf16.mxu1 %v5601_v38  ;;  %v5671_v36 = vld [vmem:[%s7464_s7 + $0x98] sm:$0xff]   ;;  %v5672_v37 = vld [vmem:[%s7464_s7 + $0x60] sm:$0xff]  }
 0x311   :  { %v5673_v38 = vld [vmem:[%s7464_s7 + $0xe0] sm:$0xff]  }
 0x313   :  { %3765 = vmatpush1.bf16.msra.mxu0 %v5596_v39  ;;  %3847 = vmatpush1.bf16.msra.mxu1 %v5599_v14  ;;  %v5674_v39 = vld [vmem:[%s7464_s7 + $0x20] sm:$0xff]  }
 0x314   :  { %3766 = vmatprep.subr.bf16.mxu0 %v5604_v40  ;;  %3848 = vmatprep.subr.bf16.mxu1 %v5607_v41  ;;  %v5675_v14 = vld [vmem:[%s7464_s7 + $0xa0] sm:$0xff]   ;;  %v5676_v40 = vld [vmem:[%s7464_s7 + $0x68] sm:$0xff]  }
 0x315   :  { %v5677_v41 = vld [vmem:[%s7464_s7 + $0xe8] sm:$0xff]  }
 0x317   :  { %3767 = vmatpush1.bf16.msra.mxu0 %v5602_v42  ;;  %3849 = vmatpush1.bf16.msra.mxu1 %v5605_v43  ;;  %v5678_v42 = vld [vmem:[%s7464_s7 + $0x28] sm:$0xff]  }
 0x318   :  { %3768 = vmatprep.subr.bf16.mxu0 %v5610_v24  ;;  %3850 = vmatprep.subr.bf16.mxu1 %v5613_v44  ;;  %v5679_v43 = vld [vmem:[%s7464_s7 + $0xa8] sm:$0xff]   ;;  %v5680_v24 = vld [vmem:[%s7464_s7 + $0x70] sm:$0xff]  }
 0x319   :  { %v5681_v44 = vld [vmem:[%s7464_s7 + $0xf0] sm:$0xff]  }
 0x31b   :  { %3769 = vmatpush1.bf16.msra.mxu0 %v5608_v45  ;;  %3851 = vmatpush1.bf16.msra.mxu1 %v5611_v46  ;;  %v5682_v45 = vld [vmem:[%s7464_s7 + $0x30] sm:$0xff]  }
 0x31c   :  { %3770 = vmatprep.subr.bf16.mxu0 %v5616_v47  ;;  %3852 = vmatprep.subr.bf16.mxu1 %v5619_v48  ;;  %v5683_v46 = vld [vmem:[%s7464_s7 + $0xb0] sm:$0xff]   ;;  %v5684_v47 = vld [vmem:[%s7464_s7 + $0x78] sm:$0xff]  }
 0x31d   :  { %v5685_v48 = vld [vmem:[%s7464_s7 + $0xf8] sm:$0xff]  }
 0x31f   :  { %3771 = vmatpush1.bf16.msra.mxu0 %v5614_v49  ;;  %3853 = vmatpush1.bf16.msra.mxu1 %v5617_v50  ;;  %v5686_v49 = vld [vmem:[%s7464_s7 + $0x38] sm:$0xff]  }
 0x320   :  { %3772 = vmatprep.subr.bf16.mxu0 %v5622_v51  ;;  %3854 = vmatprep.subr.bf16.mxu1 %v5625_v53  ;;  %v5687_v50 = vld [vmem:[%s7464_s7 + $0xb8] sm:$0xff]   ;;  %v3049_v51 = vld [vmem:[%s7466_s6] sm:$0xf] }
 0x321   :  { %v3054_v53 = vrot.slane %v3049_v51, %v6737_v17 }
 0x323   :  { %3773 = vmatpush1.bf16.msra.mxu0 %v5620_v54  ;;  %3855 = vmatpush1.bf16.msra.mxu1 %v5623_v55  ;;  %v3062_v54 = vrot.slane %v3049_v51, %v6909_v32  ;;  %v3058_v55 = vrot.slane %v3049_v51, %v6745_v18 }
 0x324   :  { %3774 = vmatprep.subr.bf16.mxu0 %v5628_v56  ;;  %3856 = vmatprep.subr.bf16.mxu1 %v5631_v58  ;;  %v3066_v56 = vrot.slane %v3049_v51, %v6748_v19 }
 0x327   :  { %3775 = vmatpush1.bf16.msra.mxu0 %v5626_v59  ;;  %3857 = vmatpush1.bf16.msra.mxu1 %v5629_v60 }
 0x328   :  { %3776 = vmatprep.subr.bf16.mxu0 %v5634_v61  ;;  %3858 = vmatprep.subr.bf16.mxu1 %v5637_v62 }
 0x32b   :  { %3777 = vmatpush1.bf16.msra.mxu0 %v5632_v63  ;;  %3859 = vmatpush1.bf16.msra.mxu1 %v5635_v0 }
 0x32c   :  { %3778 = vmatprep.subr.bf16.mxu0 %v5640_v1  ;;  %3860 = vmatprep.subr.bf16.mxu1 %v5643_v2 }
 0x32f   :  { %3779 = vmatpush1.bf16.msra.mxu0 %v5638_v3  ;;  %3861 = vmatpush1.bf16.msra.mxu1 %v5641_v4 }
 0x330   :  { %3780 = vmatprep.subr.bf16.mxu0 %v5646_v6  ;;  %3862 = vmatprep.subr.bf16.mxu1 %v5649_v7 }
 0x333   :  { %3781 = vmatpush1.bf16.msra.mxu0 %v5644_v8  ;;  %3863 = vmatpush1.bf16.msra.mxu1 %v5647_v52 }
 0x334   :  { %3782 = vmatprep.subr.bf16.mxu0 %v5652_v10  ;;  %3864 = vmatprep.subr.bf16.mxu1 %v5655_v12  ;;  %v4751_v12 = vld [vmem:[%s7467_s8] ss:$0 sm:$0xff] }
 0x337   :  { %3783 = vmatpush1.bf16.msra.mxu0 %v5650_v13  ;;  %3865 = vmatpush1.bf16.msra.mxu1 %v5653_v57 }
 0x338   :  { %4784 = vmatprep.subr.bf16.mxu0 %v5656_v11  ;;  %4806 = vmatprep.subr.bf16.mxu1 %v5657_v20 }
 0x33a   :  { %3785 = vmatmul.mubr.bf16.vlgmr.msra.gmra.mrb[8].mxu0 %v2919_v23  ;;  %3867 = vmatmul.mubr.bf16.vlgmr.msra.gmra.mrb[8].mxu1 %v2919_v23 }
 0x33b   :  { %4785 = vmatpush3.bf16.msra.mxu0 %v5658_v21  ;;  %4807 = vmatpush3.bf16.msra.mxu1 %v5659_v22 }
 0x33c   :  { %4786 = vmatprep.subr.bf16.mxu0 %v5660_v25  ;;  %4808 = vmatprep.subr.bf16.mxu1 %v5661_v26 }
 0x33f   :  { %4787 = vmatpush3.bf16.msra.mxu0 %v5662_v27  ;;  %4809 = vmatpush3.bf16.msra.mxu1 %v5663_v28 }
 0x340   :  { %4788 = vmatprep.subr.bf16.mxu0 %v5664_v29  ;;  %4810 = vmatprep.subr.bf16.mxu1 %v5665_v30 }
 0x343   :  { %4789 = vmatpush3.bf16.msra.mxu0 %v5666_v31  ;;  %4811 = vmatpush3.bf16.msra.mxu1 %v5667_v33 }
 0x344   :  { %4790 = vmatprep.subr.bf16.mxu0 %v5668_v34  ;;  %4812 = vmatprep.subr.bf16.mxu1 %v5669_v35 }
 0x347   :  { %4791 = vmatpush3.bf16.msra.mxu0 %v5670_v16  ;;  %4813 = vmatpush3.bf16.msra.mxu1 %v5671_v36 }
 0x348   :  { %4792 = vmatprep.subr.bf16.mxu0 %v5672_v37  ;;  %4814 = vmatprep.subr.bf16.mxu1 %v5673_v38 }
 0x34b   :  { %4793 = vmatpush3.bf16.msra.mxu0 %v5674_v39  ;;  %4815 = vmatpush3.bf16.msra.mxu1 %v5675_v14 }
 0x34c   :  { %4794 = vmatprep.subr.bf16.mxu0 %v5676_v40  ;;  %4816 = vmatprep.subr.bf16.mxu1 %v5677_v41 }
 0x34f   :  { %4795 = vmatpush3.bf16.msra.mxu0 %v5678_v42  ;;  %4817 = vmatpush3.bf16.msra.mxu1 %v5679_v43 }
 0x350   :  { %4796 = vmatprep.subr.bf16.mxu0 %v5680_v24  ;;  %4818 = vmatprep.subr.bf16.mxu1 %v5681_v44 }
 0x353   :  { %4797 = vmatpush3.bf16.msra.mxu0 %v5682_v45  ;;  %4819 = vmatpush3.bf16.msra.mxu1 %v5683_v46 }
 0x354   :  { %4798 = vmatprep.subr.bf16.mxu0 %v5684_v47  ;;  %4820 = vmatprep.subr.bf16.mxu1 %v5685_v48 }
 0x357   :  { %4799 = vmatpush3.bf16.msra.mxu0 %v5686_v49  ;;  %4821 = vmatpush3.bf16.msra.mxu1 %v5687_v50 }
 0x40d   :  { %v3786_v58 = vpop.f32.mrb[8].mxu0  ;;  %v3868_v59 = vpop.f32.mrb[8].mxu1 }
 0x40e   :  { %v4836_v60 = vadd.f32 %v3786_v58, %v3054_v53  ;;  %v4838_v61 = vadd.f32 %v3868_v59, %v3062_v54  ;;  %v3788_v62 = vpop.f32.mrb[9].mxu0  ;;  %v3870_v63 = vpop.f32.mrb[9].mxu1 }
 0x40f   :  { %v4837_v0 = vadd.f32 %v3788_v62, %v3058_v55  ;;  %v4839_v1 = vadd.f32 %v3870_v63, %v3066_v56  ;;  %v3790_v2 = vpop.f32.mrb[10].mxu0  ;;  %v3872_v3 = vpop.f32.mrb[10].mxu1 }
 0x410   :  { %v3875_v4 = vmax.f32 %v4836_v60, 0.0  ;;  %v3877_v5 = vmax.f32 %v4838_v61, 0.0  ;;  %v3791_v6 = vpop.f32.mrb[11].mxu0  ;;  %v3873_v17 = vpop.f32.mrb[11].mxu1 }
 0x411   :  { %v3876_v7 = vmax.f32 %v4837_v0, 0.0  ;;  %v3878_v32 = vmax.f32 %v4839_v1, 0.0 }
 0x412   :  { %v3879_v52 = vpack.c.bf16 %v3875_v4, %v3875_v4  ;;  %v3881_v19 = vpack.c.bf16 %v3877_v5, %v3877_v5 }
 0x413   :  { %v3880_v8 = vpack.c.bf16 %v3876_v7, %v3876_v7  ;;  %v3882_v18 = vpack.c.bf16 %v3878_v32, %v3878_v32 }
 0x415   :  { %4178 = vmatprep.mubr.bf16.mxu0 %v3880_v8  ;;  %4218 = vmatprep.mubr.bf16.mxu1 %v3882_v18 }
 0x416   :  { %4179 = vmatmul.mubr.bf16.vlgmr.msra.gmra.mrb[12].mxu0 %v3879_v52  ;;  %4219 = vmatmul.mubr.bf16.vlgmr.msra.gmra.mrb[12].mxu1 %v3881_v19 }
 0x4e9   :  { %v4800_v9 = vpop.f32.mrb[12].mxu0  ;;  %v4822_v10 = vpop.f32.mrb[12].mxu1 }
 0x4ea   :  { %v4801_v13 = vpop.f32.mrb[13].mxu0  ;;  %v4823_v57 = vpop.f32.mrb[13].mxu1 }
 0x4eb   :  { %v4802_v15 = vadd.f32 %v4801_v13, %v4800_v9  ;;  %v4824_v11 = vadd.f32 %v4823_v57, %v4822_v10  ;;  %v4803_v20 = vpop.f32.mrb[14].mxu0  ;;  %v4825_v21 = vpop.f32.mrb[14].mxu1 }
 0x4ec   :  { %v4804_v22 = vpop.f32.mrb[15].mxu0  ;;  %v4826_v23 = vpop.f32.mrb[15].mxu1 }
 0x4ed   :  { %v4181_v25 = vadd.f32 %v4802_v15, %v4751_v12 }
 0x4ef   :  { %v4221_v26 = vadd.f32 %v4824_v11, %v4181_v25 }
 0x4f1   :  { %4226 = vst [vmem:[%s7468_s9] sm:$0xff] %v4221_v26 }

</bundles_post_ra>
